<compile_context>
chip_gen: v7x
topology: tpu7x:2x2x1
jax: 0.10.0
libtpu: 0.0.40
codegen_flags: <defaults>
</compile_context>

<pallas_src>
import jax
import jax.numpy as jnp
import numpy as np
from jax.experimental import pallas as pl
from jax.experimental.pallas import tpu as pltpu

TB = 512          # default batch tile (multiple of 256 -> full MXU M on v6e/v7x)
H_NICE = 128      # NICE hidden width 125, zero-padded to a full lane width
H = 256           # H_net hidden width


def _mm(a, b):
    """MXU matmul, f32 accumulation (operands pre-cast by the caller)."""
    return jax.lax.dot_general(
        a, b, (((1,), (0,)), ((), ())),
        preferred_element_type=jnp.float32)


def pnn_kernel(x_ref,
               wa1t_ref, ba1_ref, wa2r_ref, ba2_ref,
               w1t_ref, b1_ref, w2t_ref, b2_ref,
               w3t_ref, b3_ref, w4t_ref, b4_ref, w5_ref,
               w4b_ref, w3b_ref, w2b_ref, w1d_ref, cp_ref,
               out_ref):
    bf16 = jnp.bfloat16
    x = x_ref[...]                                    # (TB, 4) f32

    def nice_delta(y1):
        """NICE coupling net(y1): exact f32, entirely off the MXU.

        Input layer (K=2) as two VPU broadcast FMAs; the 128->2 output
        projection as VPU multiplies + XLU lane reductions.
        Returns the two output columns as (TB, 1) each.
        """
        pre = (y1[:, 0:1] * wa1t_ref[0:1, :]
               + y1[:, 1:2] * wa1t_ref[1:2, :] + ba1_ref[...])    # (TB, 128)
        h = jnp.tanh(pre)
        c0 = jnp.sum(h * wa2r_ref[0:1, :], axis=-1, keepdims=True) + ba2_ref[:, 0:1]
        c1 = jnp.sum(h * wa2r_ref[1:2, :], axis=-1, keepdims=True) + ba2_ref[:, 1:2]
        return c0, c1

    # ---- NICE coupling forward: theta = [x1, x2 + net(x1)] ----
    n0, n1 = nice_delta(x[:, 0:2])
    theta = jnp.concatenate(
        [x[:, 0:2], x[:, 2:3] + n0, x[:, 3:4] + n1], axis=1)      # (TB, 4) f32

    # ---- H_net forward: 4 -> 256 -> 256 -> 256 -> 256 ----
    # Layer 1 (K=4) on the VPU in f32 (no bf16 cast of theta); layers 2-4 on
    # the MXU as bf16 matmuls with f32 accumulation.
    pre1 = (theta[:, 0:1] * w1t_ref[0:1, :] + theta[:, 1:2] * w1t_ref[1:2, :]
            + theta[:, 2:3] * w1t_ref[2:3, :] + theta[:, 3:4] * w1t_ref[3:4, :]
            + b1_ref[...])
    h1 = jnp.tanh(pre1)                                           # (TB, 256)
    h2 = jnp.tanh(_mm(h1.astype(bf16), w2t_ref[...]) + b2_ref[...])
    h3 = jnp.tanh(_mm(h2.astype(bf16), w3t_ref[...]) + b3_ref[...])
    h4 = jnp.tanh(_mm(h3.astype(bf16), w4t_ref[...]) + b4_ref[...])

    # ---- analytic dH/d(theta)  (replaces torch.autograd.grad) ----
    g4 = (1.0 - h4 * h4) * w5_ref[...]                            # (TB, 256)
    g3 = (1.0 - h3 * h3) * _mm(g4.astype(bf16), w4b_ref[...])
    g2 = (1.0 - h2 * h2) * _mm(g3.astype(bf16), w3b_ref[...])
    g1 = (1.0 - h1 * h1) * _mm(g2.astype(bf16), w2b_ref[...])

    # gzp = dt * [gz2*dt_q, gz3*dt_q, -gz0*dt_p, -gz1*dt_p]  (scales folded into w1d)
    gzp = _mm(g1.astype(bf16), w1d_ref[...])                      # (TB, 4)

    # extra = dt*alpha*[ (theta@Sk.T)[:, :2] | (theta@Sk)[:, 2:] ]  (folded into cp)
    extra = (theta[:, 0:1] * cp_ref[0:1, :] + theta[:, 1:2] * cp_ref[1:2, :]
             + theta[:, 2:3] * cp_ref[2:3, :] + theta[:, 3:4] * cp_ref[3:4, :])

    phi = theta + gzp + extra                                     # (TB, 4)

    # ---- NICE coupling inverse: out = [y1, y2 - net(y1)] ----
    m0, m1 = nice_delta(phi[:, 0:2])
    out_ref[...] = jnp.concatenate(
        [phi[:, 0:2], phi[:, 2:3] - m0, phi[:, 3:4] - m1], axis=1)


def prepare_params(params):
    """One-time host-side weight prep: transpose / pad / cast / fold scalars."""
    (wa1, ba1, wa2, ba2, w1, b1, w2, b2, w3, b3, w4, b4, w5, b5,
     S, dt_q, dt_p, alpha) = params
    f32, bf16 = jnp.float32, jnp.bfloat16

    # NICE net, hidden 125 zero-padded to 128 lanes (zeros contribute nothing).
    wa1t = jnp.zeros((2, H_NICE), f32).at[:, :wa1.shape[0]].set(wa1.T)
    ba1p = jnp.zeros((1, H_NICE), f32).at[:, :ba1.shape[0]].set(ba1)
    # wa2r row j = weights of output unit j (for the VPU/XLU projection).
    wa2r = jnp.zeros((2, H_NICE), f32).at[:, :wa2.shape[1]].set(wa2)
    ba2p = ba2.reshape(1, 2).astype(f32)

    dt = jnp.float32(0.1)
    # phi = theta + g1 @ w1d + theta @ cp  with
    #   w1d = w1[:, (2,3,0,1)] * dt*[dt_q, dt_q, -dt_p, -dt_p]      (256, 4)
    #   cp[k, j<2] = dt*alpha*Sk[j, k],  cp[k, j>=2] = dt*alpha*Sk[k, j]
    dvec = dt * jnp.concatenate([dt_q, dt_q, -dt_p, -dt_p]).reshape(1, 4)
    w1d = (w1[:, jnp.array([2, 3, 0, 1])] * dvec).astype(bf16)
    Sk = S - S.T
    cp = (dt * alpha * jnp.concatenate([Sk[:2, :].T, Sk[:, 2:]], axis=1)).astype(f32)

    # b5 is unused: it cancels in dH/dz.
    return (wa1t, ba1p, wa2r, ba2p,
            w1.T.astype(f32), b1.reshape(1, -1).astype(f32),     # layer 1: f32 VPU
            w2.T.astype(bf16), b2.reshape(1, -1).astype(f32),
            w3.T.astype(bf16), b3.reshape(1, -1).astype(f32),
            w4.T.astype(bf16), b4.reshape(1, -1).astype(f32),
            w5.astype(f32),
            w4.astype(bf16), w3.astype(bf16), w2.astype(bf16),
            w1d, cp)


def pnn_apply(x, prepped, tb=TB):
    """Batch-tiled pallas_call with adaptive tiling for small/ragged batches."""
    B = x.shape[0]
    Bp8 = ((B + 7) // 8) * 8
    if Bp8 <= tb:
        # Small batch: one tile, padded only to an 8-sublane multiple.
        tb_eff, Bp = Bp8, Bp8
    else:
        tb_eff = tb
        Bp = ((B + tb - 1) // tb) * tb
    xp = jnp.pad(x, ((0, Bp - B), (0, 0))) if Bp != B else x

    x_spec = pl.BlockSpec((tb_eff, 4), lambda i: (i, 0))
    weight_specs = [pl.BlockSpec(tuple(w.shape), lambda i: (0, 0)) for w in prepped]

    out = pl.pallas_call(
        pnn_kernel,
        out_shape=jax.ShapeDtypeStruct((Bp, 4), jnp.float32),
        grid=(Bp // tb_eff,),
        in_specs=[x_spec] + weight_specs,
        out_specs=pl.BlockSpec((tb_eff, 4), lambda i: (i, 0)),
        compiler_params=pltpu.CompilerParams(
            dimension_semantics=("parallel",),          # megacore split on v7x
            vmem_limit_bytes=32 * 1024 * 1024),
    )(xp, *prepped)
    return out[:B]


def pnn_reference(x, params):
    """Pure-JAX f32/HIGHEST ground truth (uses autodiff for dH/dz)."""
    (wa1, ba1, wa2, ba2, w1, b1, w2, b2, w3, b3, w4, b4, w5, b5,
     S, dt_q, dt_p, alpha) = params
    hi = jax.lax.Precision.HIGHEST

    def nice_net(v):
        h = jnp.tanh(jnp.dot(v, wa1.T, precision=hi) + ba1)
        return jnp.dot(h, wa2.T, precision=hi) + ba2

    x1, x2 = x[:, :2], x[:, 2:]
    theta = jnp.concatenate([x1, x2 + nice_net(x1)], axis=1)

    def H_single(z):
        h = jnp.tanh(jnp.dot(w1, z, precision=hi) + b1)
        h = jnp.tanh(jnp.dot(w2, h, precision=hi) + b2)
        h = jnp.tanh(jnp.dot(w3, h, precision=hi) + b3)
        h = jnp.tanh(jnp.dot(w4, h, precision=hi) + b4)
        return (jnp.dot(w5, h, precision=hi) + b5)[0]

    gz = jax.vmap(jax.grad(H_single))(theta)
    dHdz1, dHdz2 = gz[:, :2], gz[:, 2:]
    Sk = S - S.T
    dz1 = dHdz2 * dt_q + alpha * jnp.dot(theta, Sk.T, precision=hi)[:, :2]
    dz2 = -dHdz1 * dt_p + alpha * jnp.dot(theta, Sk, precision=hi)[:, 2:]
    phi = theta + 0.1 * jnp.concatenate([dz1, dz2], axis=1)
    y1, y2 = phi[:, :2], phi[:, 2:]
    return jnp.concatenate([y1, y2 - nice_net(y1)], axis=1)


def init_params(key):
    ks = jax.random.split(key, 10)

    def lin(k, out_f, in_f):
        kw, kb = jax.random.split(k)
        bound = 1.0 / np.sqrt(in_f)
        w = jax.random.uniform(kw, (out_f, in_f), jnp.float32, -bound, bound)
        b = jax.random.uniform(kb, (out_f,), jnp.float32, -bound, bound)
        return w, b

    wa1, ba1 = lin(ks[0], 125, 2)      # NICE net: Linear(2, 125)
    wa2, ba2 = lin(ks[1], 2, 125)      # NICE net: Linear(125, 2)
    w1, b1 = lin(ks[2], H, 4)          # H_net: Linear(4, 256)
    w2, b2 = lin(ks[3], H, H)
    w3, b3 = lin(ks[4], H, H)
    w4, b4 = lin(ks[5], H, H)
    w5, b5 = lin(ks[6], 1, H)          # H_net: Linear(256, 1)
    S = 0.1 * jax.random.normal(ks[7], (4, 4), jnp.float32)
    dt_q = 0.5 + 0.1 * jax.random.normal(ks[8], (1,), jnp.float32)
    dt_p = 0.5 + 0.1 * jax.random.normal(ks[9], (1,), jnp.float32)
    alpha = jnp.float32(0.01)
    return (wa1, ba1, wa2, ba2, w1, b1, w2, b2, w3, b3, w4, b4, w5, b5,
            S, dt_q, dt_p, alpha)


if __name__ == "__main__":
    key = jax.random.PRNGKey(0)
    kp, kx = jax.random.split(key)
    params = init_params(kp)
    prepped = prepare_params(params)          # one-time host-side weight prep

    B = 16                                    # small deterministic example batch
    x = jax.random.normal(kx, (B, 4), jnp.float32)

    out = jax.block_until_ready(jax.jit(pnn_apply)(x, prepped))
    ref = jax.block_until_ready(jax.jit(pnn_reference)(x, params))
    np.testing.assert_allclose(np.asarray(out), np.asarray(ref),
                               atol=2e-3, rtol=2e-3)
    print("KERNEL_OK")
</pallas_src>

<mosaic_0001>
module attributes {stable_mosaic.version = 11 : i64} {
  func.func @pnn_kernel(%arg0: i32, %arg1: memref<16x4xf32, #tpu.memory_space<vmem>>, %arg2: memref<2x128xf32, #tpu.memory_space<vmem>>, %arg3: memref<1x128xf32, #tpu.memory_space<vmem>>, %arg4: memref<2x128xf32, #tpu.memory_space<vmem>>, %arg5: memref<1x2xf32, #tpu.memory_space<vmem>>, %arg6: memref<4x256xf32, #tpu.memory_space<vmem>>, %arg7: memref<1x256xf32, #tpu.memory_space<vmem>>, %arg8: memref<256x256xbf16, #tpu.memory_space<vmem>>, %arg9: memref<1x256xf32, #tpu.memory_space<vmem>>, %arg10: memref<256x256xbf16, #tpu.memory_space<vmem>>, %arg11: memref<1x256xf32, #tpu.memory_space<vmem>>, %arg12: memref<256x256xbf16, #tpu.memory_space<vmem>>, %arg13: memref<1x256xf32, #tpu.memory_space<vmem>>, %arg14: memref<1x256xf32, #tpu.memory_space<vmem>>, %arg15: memref<256x256xbf16, #tpu.memory_space<vmem>>, %arg16: memref<256x256xbf16, #tpu.memory_space<vmem>>, %arg17: memref<256x256xbf16, #tpu.memory_space<vmem>>, %arg18: memref<256x4xbf16, #tpu.memory_space<vmem>>, %arg19: memref<4x4xf32, #tpu.memory_space<vmem>>, %arg20: memref<16x4xf32, #tpu.memory_space<vmem>>) attributes {dimension_semantics = [#tpu.dimension_semantics<parallel>], iteration_bounds = array<i64: 1>, scalar_prefetch = 0 : i64, scratch_operands = 0 : i64, tpu.core_type = #tpu.core_type<tc>, window_params = [{transform_indices = @transform_0, window_bounds = array<i64: 16, 4>}, {pipeline_mode = #tpu.pipeline_mode<synchronous>, transform_indices = @transform_1, window_bounds = array<i64: 2, 128>}, {pipeline_mode = #tpu.pipeline_mode<synchronous>, transform_indices = @transform_2, window_bounds = array<i64: 1, 128>}, {pipeline_mode = #tpu.pipeline_mode<synchronous>, transform_indices = @transform_3, window_bounds = array<i64: 2, 128>}, {pipeline_mode = #tpu.pipeline_mode<synchronous>, transform_indices = @transform_4, window_bounds = array<i64: 1, 2>}, {pipeline_mode = #tpu.pipeline_mode<synchronous>, transform_indices = @transform_5, window_bounds = array<i64: 4, 256>}, {pipeline_mode = #tpu.pipeline_mode<synchronous>, transform_indices = @transform_6, window_bounds = array<i64: 1, 256>}, {pipeline_mode = #tpu.pipeline_mode<synchronous>, transform_indices = @transform_7, window_bounds = array<i64: 256, 256>}, {pipeline_mode = #tpu.pipeline_mode<synchronous>, transform_indices = @transform_8, window_bounds = array<i64: 1, 256>}, {pipeline_mode = #tpu.pipeline_mode<synchronous>, transform_indices = @transform_9, window_bounds = array<i64: 256, 256>}, {pipeline_mode = #tpu.pipeline_mode<synchronous>, transform_indices = @transform_10, window_bounds = array<i64: 1, 256>}, {pipeline_mode = #tpu.pipeline_mode<synchronous>, transform_indices = @transform_11, window_bounds = array<i64: 256, 256>}, {pipeline_mode = #tpu.pipeline_mode<synchronous>, transform_indices = @transform_12, window_bounds = array<i64: 1, 256>}, {pipeline_mode = #tpu.pipeline_mode<synchronous>, transform_indices = @transform_13, window_bounds = array<i64: 1, 256>}, {pipeline_mode = #tpu.pipeline_mode<synchronous>, transform_indices = @transform_14, window_bounds = array<i64: 256, 256>}, {pipeline_mode = #tpu.pipeline_mode<synchronous>, transform_indices = @transform_15, window_bounds = array<i64: 256, 256>}, {pipeline_mode = #tpu.pipeline_mode<synchronous>, transform_indices = @transform_16, window_bounds = array<i64: 256, 256>}, {pipeline_mode = #tpu.pipeline_mode<synchronous>, transform_indices = @transform_17, window_bounds = array<i64: 256, 4>}, {pipeline_mode = #tpu.pipeline_mode<synchronous>, transform_indices = @transform_18, window_bounds = array<i64: 4, 4>}, {transform_indices = @transform_19, window_bounds = array<i64: 16, 4>}]} {
    %c0 = arith.constant 0 : index
    %c0_0 = arith.constant 0 : index
    %0 = vector.load %arg1[%c0, %c0_0] : memref<16x4xf32, #tpu.memory_space<vmem>>, vector<16x4xf32>
    %1 = vector.extract_strided_slice %0 {offsets = [0, 0], sizes = [16, 2], strides = [1, 1]} : vector<16x4xf32> to vector<16x2xf32>
    %2 = vector.extract_strided_slice %1 {offsets = [0, 0], sizes = [16, 1], strides = [1, 1]} : vector<16x2xf32> to vector<16x1xf32>
    %c0_1 = arith.constant 0 : index
    %c0_2 = arith.constant 0 : index
    %3 = vector.load %arg2[%c0_1, %c0_2] : memref<2x128xf32, #tpu.memory_space<vmem>>, vector<1x128xf32>
    %4 = vector.broadcast %2 : vector<16x1xf32> to vector<16x128xf32>
    %5 = vector.broadcast %3 : vector<1x128xf32> to vector<16x128xf32>
    %6 = arith.mulf %4, %5 : vector<16x128xf32>
    %7 = vector.extract_strided_slice %1 {offsets = [0, 1], sizes = [16, 1], strides = [1, 1]} : vector<16x2xf32> to vector<16x1xf32>
    %c1 = arith.constant 1 : index
    %c0_3 = arith.constant 0 : index
    %8 = vector.load %arg2[%c1, %c0_3] : memref<2x128xf32, #tpu.memory_space<vmem>>, vector<1x128xf32>
    %9 = vector.broadcast %7 : vector<16x1xf32> to vector<16x128xf32>
    %10 = vector.broadcast %8 : vector<1x128xf32> to vector<16x128xf32>
    %11 = arith.mulf %9, %10 : vector<16x128xf32>
    %12 = arith.addf %6, %11 : vector<16x128xf32>
    %c0_4 = arith.constant 0 : index
    %c0_5 = arith.constant 0 : index
    %13 = vector.load %arg3[%c0_4, %c0_5] : memref<1x128xf32, #tpu.memory_space<vmem>>, vector<1x128xf32>
    %14 = vector.broadcast %13 : vector<1x128xf32> to vector<16x128xf32>
    %15 = arith.addf %12, %14 : vector<16x128xf32>
    %16 = math.tanh %15 : vector<16x128xf32>
    %c0_6 = arith.constant 0 : index
    %c0_7 = arith.constant 0 : index
    %17 = vector.load %arg4[%c0_6, %c0_7] : memref<2x128xf32, #tpu.memory_space<vmem>>, vector<1x128xf32>
    %18 = vector.broadcast %17 : vector<1x128xf32> to vector<16x128xf32>
    %19 = arith.mulf %16, %18 : vector<16x128xf32>
    %cst = arith.constant dense<0.000000e+00> : vector<16xf32>
    %20 = vector.multi_reduction <add>, %19, %cst [1] : vector<16x128xf32> to vector<16xf32>
    %21 = vector.shape_cast %20 : vector<16xf32> to vector<16x1xf32>
    %c0_8 = arith.constant 0 : index
    %c0_9 = arith.constant 0 : index
    %22 = vector.load %arg5[%c0_8, %c0_9] : memref<1x2xf32, #tpu.memory_space<vmem>>, vector<1x1xf32>
    %23 = vector.broadcast %22 : vector<1x1xf32> to vector<16x1xf32>
    %24 = arith.addf %21, %23 : vector<16x1xf32>
    %c1_10 = arith.constant 1 : index
    %c0_11 = arith.constant 0 : index
    %25 = vector.load %arg4[%c1_10, %c0_11] : memref<2x128xf32, #tpu.memory_space<vmem>>, vector<1x128xf32>
    %26 = vector.broadcast %25 : vector<1x128xf32> to vector<16x128xf32>
    %27 = arith.mulf %16, %26 : vector<16x128xf32>
    %cst_12 = arith.constant dense<0.000000e+00> : vector<16xf32>
    %28 = vector.multi_reduction <add>, %27, %cst_12 [1] : vector<16x128xf32> to vector<16xf32>
    %29 = vector.shape_cast %28 : vector<16xf32> to vector<16x1xf32>
    %c0_13 = arith.constant 0 : index
    %c1_14 = arith.constant 1 : index
    %30 = vector.load %arg5[%c0_13, %c1_14] : memref<1x2xf32, #tpu.memory_space<vmem>>, vector<1x1xf32>
    %31 = vector.broadcast %30 : vector<1x1xf32> to vector<16x1xf32>
    %32 = arith.addf %29, %31 : vector<16x1xf32>
    %33 = vector.extract_strided_slice %0 {offsets = [0, 0], sizes = [16, 2], strides = [1, 1]} : vector<16x4xf32> to vector<16x2xf32>
    %34 = vector.extract_strided_slice %0 {offsets = [0, 2], sizes = [16, 1], strides = [1, 1]} : vector<16x4xf32> to vector<16x1xf32>
    %35 = arith.addf %34, %24 : vector<16x1xf32>
    %36 = vector.extract_strided_slice %0 {offsets = [0, 3], sizes = [16, 1], strides = [1, 1]} : vector<16x4xf32> to vector<16x1xf32>
    %37 = arith.addf %36, %32 : vector<16x1xf32>
    %38 = tpu.concatenate %33, %35, %37 in 1 : vector<16x2xf32>, vector<16x1xf32>, vector<16x1xf32> -> vector<16x4xf32>
    %39 = vector.extract_strided_slice %38 {offsets = [0, 0], sizes = [16, 1], strides = [1, 1]} : vector<16x4xf32> to vector<16x1xf32>
    %c0_15 = arith.constant 0 : index
    %c0_16 = arith.constant 0 : index
    %40 = vector.load %arg6[%c0_15, %c0_16] : memref<4x256xf32, #tpu.memory_space<vmem>>, vector<1x256xf32>
    %41 = vector.broadcast %39 : vector<16x1xf32> to vector<16x256xf32>
    %42 = vector.broadcast %40 : vector<1x256xf32> to vector<16x256xf32>
    %43 = arith.mulf %41, %42 : vector<16x256xf32>
    %44 = vector.extract_strided_slice %38 {offsets = [0, 1], sizes = [16, 1], strides = [1, 1]} : vector<16x4xf32> to vector<16x1xf32>
    %c1_17 = arith.constant 1 : index
    %c0_18 = arith.constant 0 : index
    %45 = vector.load %arg6[%c1_17, %c0_18] : memref<4x256xf32, #tpu.memory_space<vmem>>, vector<1x256xf32>
    %46 = vector.broadcast %44 : vector<16x1xf32> to vector<16x256xf32>
    %47 = vector.broadcast %45 : vector<1x256xf32> to vector<16x256xf32>
    %48 = arith.mulf %46, %47 : vector<16x256xf32>
    %49 = arith.addf %43, %48 : vector<16x256xf32>
    %50 = vector.extract_strided_slice %38 {offsets = [0, 2], sizes = [16, 1], strides = [1, 1]} : vector<16x4xf32> to vector<16x1xf32>
    %c2 = arith.constant 2 : index
    %c0_19 = arith.constant 0 : index
    %51 = vector.load %arg6[%c2, %c0_19] : memref<4x256xf32, #tpu.memory_space<vmem>>, vector<1x256xf32>
    %52 = vector.broadcast %50 : vector<16x1xf32> to vector<16x256xf32>
    %53 = vector.broadcast %51 : vector<1x256xf32> to vector<16x256xf32>
    %54 = arith.mulf %52, %53 : vector<16x256xf32>
    %55 = arith.addf %49, %54 : vector<16x256xf32>
    %56 = vector.extract_strided_slice %38 {offsets = [0, 3], sizes = [16, 1], strides = [1, 1]} : vector<16x4xf32> to vector<16x1xf32>
    %c3 = arith.constant 3 : index
    %c0_20 = arith.constant 0 : index
    %57 = vector.load %arg6[%c3, %c0_20] : memref<4x256xf32, #tpu.memory_space<vmem>>, vector<1x256xf32>
    %58 = vector.broadcast %56 : vector<16x1xf32> to vector<16x256xf32>
    %59 = vector.broadcast %57 : vector<1x256xf32> to vector<16x256xf32>
    %60 = arith.mulf %58, %59 : vector<16x256xf32>
    %61 = arith.addf %55, %60 : vector<16x256xf32>
    %c0_21 = arith.constant 0 : index
    %c0_22 = arith.constant 0 : index
    %62 = vector.load %arg7[%c0_21, %c0_22] : memref<1x256xf32, #tpu.memory_space<vmem>>, vector<1x256xf32>
    %63 = vector.broadcast %62 : vector<1x256xf32> to vector<16x256xf32>
    %64 = arith.addf %61, %63 : vector<16x256xf32>
    %65 = math.tanh %64 : vector<16x256xf32>
    %66 = arith.truncf %65 : vector<16x256xf32> to vector<16x256xbf16>
    %c0_23 = arith.constant 0 : index
    %c0_24 = arith.constant 0 : index
    %67 = vector.load %arg8[%c0_23, %c0_24] : memref<256x256xbf16, #tpu.memory_space<vmem>>, vector<256x256xbf16>
    %cst_25 = arith.constant dense<0.000000e+00> : vector<16x256xf32>
    %68 = tpu.matmul %66, %67, %cst_25 {dimension_numbers = #tpu.dot_dimension_numbers<[1], [0], [0], [1], [0, 0, 1, 1], [], []>} : vector<16x256xbf16>, vector<256x256xbf16>, vector<16x256xf32> -> vector<16x256xf32>
    %c0_26 = arith.constant 0 : index
    %c0_27 = arith.constant 0 : index
    %69 = vector.load %arg9[%c0_26, %c0_27] : memref<1x256xf32, #tpu.memory_space<vmem>>, vector<1x256xf32>
    %70 = vector.broadcast %69 : vector<1x256xf32> to vector<16x256xf32>
    %71 = arith.addf %68, %70 : vector<16x256xf32>
    %72 = math.tanh %71 : vector<16x256xf32>
    %73 = arith.truncf %72 : vector<16x256xf32> to vector<16x256xbf16>
    %c0_28 = arith.constant 0 : index
    %c0_29 = arith.constant 0 : index
    %74 = vector.load %arg10[%c0_28, %c0_29] : memref<256x256xbf16, #tpu.memory_space<vmem>>, vector<256x256xbf16>
    %cst_30 = arith.constant dense<0.000000e+00> : vector<16x256xf32>
    %75 = tpu.matmul %73, %74, %cst_30 {dimension_numbers = #tpu.dot_dimension_numbers<[1], [0], [0], [1], [0, 0, 1, 1], [], []>} : vector<16x256xbf16>, vector<256x256xbf16>, vector<16x256xf32> -> vector<16x256xf32>
    %c0_31 = arith.constant 0 : index
    %c0_32 = arith.constant 0 : index
    %76 = vector.load %arg11[%c0_31, %c0_32] : memref<1x256xf32, #tpu.memory_space<vmem>>, vector<1x256xf32>
    %77 = vector.broadcast %76 : vector<1x256xf32> to vector<16x256xf32>
    %78 = arith.addf %75, %77 : vector<16x256xf32>
    %79 = math.tanh %78 : vector<16x256xf32>
    %80 = arith.truncf %79 : vector<16x256xf32> to vector<16x256xbf16>
    %c0_33 = arith.constant 0 : index
    %c0_34 = arith.constant 0 : index
    %81 = vector.load %arg12[%c0_33, %c0_34] : memref<256x256xbf16, #tpu.memory_space<vmem>>, vector<256x256xbf16>
    %cst_35 = arith.constant dense<0.000000e+00> : vector<16x256xf32>
    %82 = tpu.matmul %80, %81, %cst_35 {dimension_numbers = #tpu.dot_dimension_numbers<[1], [0], [0], [1], [0, 0, 1, 1], [], []>} : vector<16x256xbf16>, vector<256x256xbf16>, vector<16x256xf32> -> vector<16x256xf32>
    %c0_36 = arith.constant 0 : index
    %c0_37 = arith.constant 0 : index
    %83 = vector.load %arg13[%c0_36, %c0_37] : memref<1x256xf32, #tpu.memory_space<vmem>>, vector<1x256xf32>
    %84 = vector.broadcast %83 : vector<1x256xf32> to vector<16x256xf32>
    %85 = arith.addf %82, %84 : vector<16x256xf32>
    %86 = math.tanh %85 : vector<16x256xf32>
    %87 = arith.mulf %86, %86 : vector<16x256xf32>
    %cst_38 = arith.constant 1.000000e+00 : f32
    %88 = vector.broadcast %cst_38 : f32 to vector<16x256xf32>
    %89 = arith.subf %88, %87 : vector<16x256xf32>
    %c0_39 = arith.constant 0 : index
    %c0_40 = arith.constant 0 : index
    %90 = vector.load %arg14[%c0_39, %c0_40] : memref<1x256xf32, #tpu.memory_space<vmem>>, vector<1x256xf32>
    %91 = vector.broadcast %90 : vector<1x256xf32> to vector<16x256xf32>
    %92 = arith.mulf %89, %91 : vector<16x256xf32>
    %93 = arith.mulf %79, %79 : vector<16x256xf32>
    %cst_41 = arith.constant 1.000000e+00 : f32
    %94 = vector.broadcast %cst_41 : f32 to vector<16x256xf32>
    %95 = arith.subf %94, %93 : vector<16x256xf32>
    %96 = arith.truncf %92 : vector<16x256xf32> to vector<16x256xbf16>
    %c0_42 = arith.constant 0 : index
    %c0_43 = arith.constant 0 : index
    %97 = vector.load %arg15[%c0_42, %c0_43] : memref<256x256xbf16, #tpu.memory_space<vmem>>, vector<256x256xbf16>
    %cst_44 = arith.constant dense<0.000000e+00> : vector<16x256xf32>
    %98 = tpu.matmul %96, %97, %cst_44 {dimension_numbers = #tpu.dot_dimension_numbers<[1], [0], [0], [1], [0, 0, 1, 1], [], []>} : vector<16x256xbf16>, vector<256x256xbf16>, vector<16x256xf32> -> vector<16x256xf32>
    %99 = arith.mulf %95, %98 : vector<16x256xf32>
    %100 = arith.mulf %72, %72 : vector<16x256xf32>
    %cst_45 = arith.constant 1.000000e+00 : f32
    %101 = vector.broadcast %cst_45 : f32 to vector<16x256xf32>
    %102 = arith.subf %101, %100 : vector<16x256xf32>
    %103 = arith.truncf %99 : vector<16x256xf32> to vector<16x256xbf16>
    %c0_46 = arith.constant 0 : index
    %c0_47 = arith.constant 0 : index
    %104 = vector.load %arg16[%c0_46, %c0_47] : memref<256x256xbf16, #tpu.memory_space<vmem>>, vector<256x256xbf16>
    %cst_48 = arith.constant dense<0.000000e+00> : vector<16x256xf32>
    %105 = tpu.matmul %103, %104, %cst_48 {dimension_numbers = #tpu.dot_dimension_numbers<[1], [0], [0], [1], [0, 0, 1, 1], [], []>} : vector<16x256xbf16>, vector<256x256xbf16>, vector<16x256xf32> -> vector<16x256xf32>
    %106 = arith.mulf %102, %105 : vector<16x256xf32>
    %107 = arith.mulf %65, %65 : vector<16x256xf32>
    %cst_49 = arith.constant 1.000000e+00 : f32
    %108 = vector.broadcast %cst_49 : f32 to vector<16x256xf32>
    %109 = arith.subf %108, %107 : vector<16x256xf32>
    %110 = arith.truncf %106 : vector<16x256xf32> to vector<16x256xbf16>
    %c0_50 = arith.constant 0 : index
    %c0_51 = arith.constant 0 : index
    %111 = vector.load %arg17[%c0_50, %c0_51] : memref<256x256xbf16, #tpu.memory_space<vmem>>, vector<256x256xbf16>
    %cst_52 = arith.constant dense<0.000000e+00> : vector<16x256xf32>
    %112 = tpu.matmul %110, %111, %cst_52 {dimension_numbers = #tpu.dot_dimension_numbers<[1], [0], [0], [1], [0, 0, 1, 1], [], []>} : vector<16x256xbf16>, vector<256x256xbf16>, vector<16x256xf32> -> vector<16x256xf32>
    %113 = arith.mulf %109, %112 : vector<16x256xf32>
    %114 = arith.truncf %113 : vector<16x256xf32> to vector<16x256xbf16>
    %c0_53 = arith.constant 0 : index
    %c0_54 = arith.constant 0 : index
    %115 = vector.load %arg18[%c0_53, %c0_54] : memref<256x4xbf16, #tpu.memory_space<vmem>>, vector<256x4xbf16>
    %cst_55 = arith.constant dense<0.000000e+00> : vector<16x4xf32>
    %116 = tpu.matmul %114, %115, %cst_55 {dimension_numbers = #tpu.dot_dimension_numbers<[1], [0], [0], [1], [0, 0, 1, 1], [], []>} : vector<16x256xbf16>, vector<256x4xbf16>, vector<16x4xf32> -> vector<16x4xf32>
    %117 = vector.extract_strided_slice %38 {offsets = [0, 0], sizes = [16, 1], strides = [1, 1]} : vector<16x4xf32> to vector<16x1xf32>
    %c0_56 = arith.constant 0 : index
    %c0_57 = arith.constant 0 : index
    %118 = vector.load %arg19[%c0_56, %c0_57] : memref<4x4xf32, #tpu.memory_space<vmem>>, vector<1x4xf32>
    %119 = vector.broadcast %117 : vector<16x1xf32> to vector<16x4xf32>
    %120 = vector.broadcast %118 : vector<1x4xf32> to vector<16x4xf32>
    %121 = arith.mulf %119, %120 : vector<16x4xf32>
    %122 = vector.extract_strided_slice %38 {offsets = [0, 1], sizes = [16, 1], strides = [1, 1]} : vector<16x4xf32> to vector<16x1xf32>
    %c1_58 = arith.constant 1 : index
    %c0_59 = arith.constant 0 : index
    %123 = vector.load %arg19[%c1_58, %c0_59] : memref<4x4xf32, #tpu.memory_space<vmem>>, vector<1x4xf32>
    %124 = vector.broadcast %122 : vector<16x1xf32> to vector<16x4xf32>
    %125 = vector.broadcast %123 : vector<1x4xf32> to vector<16x4xf32>
    %126 = arith.mulf %124, %125 : vector<16x4xf32>
    %127 = arith.addf %121, %126 : vector<16x4xf32>
    %128 = vector.extract_strided_slice %38 {offsets = [0, 2], sizes = [16, 1], strides = [1, 1]} : vector<16x4xf32> to vector<16x1xf32>
    %c2_60 = arith.constant 2 : index
    %c0_61 = arith.constant 0 : index
    %129 = vector.load %arg19[%c2_60, %c0_61] : memref<4x4xf32, #tpu.memory_space<vmem>>, vector<1x4xf32>
    %130 = vector.broadcast %128 : vector<16x1xf32> to vector<16x4xf32>
    %131 = vector.broadcast %129 : vector<1x4xf32> to vector<16x4xf32>
    %132 = arith.mulf %130, %131 : vector<16x4xf32>
    %133 = arith.addf %127, %132 : vector<16x4xf32>
    %134 = vector.extract_strided_slice %38 {offsets = [0, 3], sizes = [16, 1], strides = [1, 1]} : vector<16x4xf32> to vector<16x1xf32>
    %c3_62 = arith.constant 3 : index
    %c0_63 = arith.constant 0 : index
    %135 = vector.load %arg19[%c3_62, %c0_63] : memref<4x4xf32, #tpu.memory_space<vmem>>, vector<1x4xf32>
    %136 = vector.broadcast %134 : vector<16x1xf32> to vector<16x4xf32>
    %137 = vector.broadcast %135 : vector<1x4xf32> to vector<16x4xf32>
    %138 = arith.mulf %136, %137 : vector<16x4xf32>
    %139 = arith.addf %133, %138 : vector<16x4xf32>
    %140 = arith.addf %38, %116 : vector<16x4xf32>
    %141 = arith.addf %140, %139 : vector<16x4xf32>
    %142 = vector.extract_strided_slice %141 {offsets = [0, 0], sizes = [16, 2], strides = [1, 1]} : vector<16x4xf32> to vector<16x2xf32>
    %143 = vector.extract_strided_slice %142 {offsets = [0, 0], sizes = [16, 1], strides = [1, 1]} : vector<16x2xf32> to vector<16x1xf32>
    %c0_64 = arith.constant 0 : index
    %c0_65 = arith.constant 0 : index
    %144 = vector.load %arg2[%c0_64, %c0_65] : memref<2x128xf32, #tpu.memory_space<vmem>>, vector<1x128xf32>
    %145 = vector.broadcast %143 : vector<16x1xf32> to vector<16x128xf32>
    %146 = vector.broadcast %144 : vector<1x128xf32> to vector<16x128xf32>
    %147 = arith.mulf %145, %146 : vector<16x128xf32>
    %148 = vector.extract_strided_slice %142 {offsets = [0, 1], sizes = [16, 1], strides = [1, 1]} : vector<16x2xf32> to vector<16x1xf32>
    %c1_66 = arith.constant 1 : index
    %c0_67 = arith.constant 0 : index
    %149 = vector.load %arg2[%c1_66, %c0_67] : memref<2x128xf32, #tpu.memory_space<vmem>>, vector<1x128xf32>
    %150 = vector.broadcast %148 : vector<16x1xf32> to vector<16x128xf32>
    %151 = vector.broadcast %149 : vector<1x128xf32> to vector<16x128xf32>
    %152 = arith.mulf %150, %151 : vector<16x128xf32>
    %153 = arith.addf %147, %152 : vector<16x128xf32>
    %c0_68 = arith.constant 0 : index
    %c0_69 = arith.constant 0 : index
    %154 = vector.load %arg3[%c0_68, %c0_69] : memref<1x128xf32, #tpu.memory_space<vmem>>, vector<1x128xf32>
    %155 = vector.broadcast %154 : vector<1x128xf32> to vector<16x128xf32>
    %156 = arith.addf %153, %155 : vector<16x128xf32>
    %157 = math.tanh %156 : vector<16x128xf32>
    %c0_70 = arith.constant 0 : index
    %c0_71 = arith.constant 0 : index
    %158 = vector.load %arg4[%c0_70, %c0_71] : memref<2x128xf32, #tpu.memory_space<vmem>>, vector<1x128xf32>
    %159 = vector.broadcast %158 : vector<1x128xf32> to vector<16x128xf32>
    %160 = arith.mulf %157, %159 : vector<16x128xf32>
    %cst_72 = arith.constant dense<0.000000e+00> : vector<16xf32>
    %161 = vector.multi_reduction <add>, %160, %cst_72 [1] : vector<16x128xf32> to vector<16xf32>
    %162 = vector.shape_cast %161 : vector<16xf32> to vector<16x1xf32>
    %c0_73 = arith.constant 0 : index
    %c0_74 = arith.constant 0 : index
    %163 = vector.load %arg5[%c0_73, %c0_74] : memref<1x2xf32, #tpu.memory_space<vmem>>, vector<1x1xf32>
    %164 = vector.broadcast %163 : vector<1x1xf32> to vector<16x1xf32>
    %165 = arith.addf %162, %164 : vector<16x1xf32>
    %c1_75 = arith.constant 1 : index
    %c0_76 = arith.constant 0 : index
    %166 = vector.load %arg4[%c1_75, %c0_76] : memref<2x128xf32, #tpu.memory_space<vmem>>, vector<1x128xf32>
    %167 = vector.broadcast %166 : vector<1x128xf32> to vector<16x128xf32>
    %168 = arith.mulf %157, %167 : vector<16x128xf32>
    %cst_77 = arith.constant dense<0.000000e+00> : vector<16xf32>
    %169 = vector.multi_reduction <add>, %168, %cst_77 [1] : vector<16x128xf32> to vector<16xf32>
    %170 = vector.shape_cast %169 : vector<16xf32> to vector<16x1xf32>
    %c0_78 = arith.constant 0 : index
    %c1_79 = arith.constant 1 : index
    %171 = vector.load %arg5[%c0_78, %c1_79] : memref<1x2xf32, #tpu.memory_space<vmem>>, vector<1x1xf32>
    %172 = vector.broadcast %171 : vector<1x1xf32> to vector<16x1xf32>
    %173 = arith.addf %170, %172 : vector<16x1xf32>
    %174 = vector.extract_strided_slice %141 {offsets = [0, 0], sizes = [16, 2], strides = [1, 1]} : vector<16x4xf32> to vector<16x2xf32>
    %175 = vector.extract_strided_slice %141 {offsets = [0, 2], sizes = [16, 1], strides = [1, 1]} : vector<16x4xf32> to vector<16x1xf32>
    %176 = arith.subf %175, %165 : vector<16x1xf32>
    %177 = vector.extract_strided_slice %141 {offsets = [0, 3], sizes = [16, 1], strides = [1, 1]} : vector<16x4xf32> to vector<16x1xf32>
    %178 = arith.subf %177, %173 : vector<16x1xf32>
    %179 = tpu.concatenate %174, %176, %178 in 1 : vector<16x2xf32>, vector<16x1xf32>, vector<16x1xf32> -> vector<16x4xf32>
    %c0_80 = arith.constant 0 : index
    %c0_81 = arith.constant 0 : index
    %180 = vector.load %arg20[%c0_80, %c0_81] : memref<16x4xf32, #tpu.memory_space<vmem>>, vector<16x4xf32>
    tpu.vector_store %arg20[%c0_80, %c0_81], %179 {strides = array<i32>} : memref<16x4xf32, #tpu.memory_space<vmem>>, vector<16x4xf32>,
    return
  }
  func.func @transform_0(%arg0: i32) -> (i32, i32) {
    %c0_i32 = arith.constant 0 : i32
    %c0_i32_0 = arith.constant 0 : i32
    return %arg0, %c0_i32 : i32, i32
  }
  func.func @transform_1(%arg0: i32) -> (i32, i32) {
    %c0_i32 = arith.constant 0 : i32
    %c0_i32_0 = arith.constant 0 : i32
    %c0_i32_1 = arith.constant 0 : i32
    return %c0_i32, %c0_i32_0 : i32, i32
  }
  func.func @transform_2(%arg0: i32) -> (i32, i32) {
    %c0_i32 = arith.constant 0 : i32
    %c0_i32_0 = arith.constant 0 : i32
    %c0_i32_1 = arith.constant 0 : i32
    return %c0_i32, %c0_i32_0 : i32, i32
  }
  func.func @transform_3(%arg0: i32) -> (i32, i32) {
    %c0_i32 = arith.constant 0 : i32
    %c0_i32_0 = arith.constant 0 : i32
    %c0_i32_1 = arith.constant 0 : i32
    return %c0_i32, %c0_i32_0 : i32, i32
  }
  func.func @transform_4(%arg0: i32) -> (i32, i32) {
    %c0_i32 = arith.constant 0 : i32
    %c0_i32_0 = arith.constant 0 : i32
    %c0_i32_1 = arith.constant 0 : i32
    return %c0_i32, %c0_i32_0 : i32, i32
  }
  func.func @transform_5(%arg0: i32) -> (i32, i32) {
    %c0_i32 = arith.constant 0 : i32
    %c0_i32_0 = arith.constant 0 : i32
    %c0_i32_1 = arith.constant 0 : i32
    return %c0_i32, %c0_i32_0 : i32, i32
  }
  func.func @transform_6(%arg0: i32) -> (i32, i32) {
    %c0_i32 = arith.constant 0 : i32
    %c0_i32_0 = arith.constant 0 : i32
    %c0_i32_1 = arith.constant 0 : i32
    return %c0_i32, %c0_i32_0 : i32, i32
  }
  func.func @transform_7(%arg0: i32) -> (i32, i32) {
    %c0_i32 = arith.constant 0 : i32
    %c0_i32_0 = arith.constant 0 : i32
    %c0_i32_1 = arith.constant 0 : i32
    return %c0_i32, %c0_i32_0 : i32, i32
  }
  func.func @transform_8(%arg0: i32) -> (i32, i32) {
    %c0_i32 = arith.constant 0 : i32
    %c0_i32_0 = arith.constant 0 : i32
    %c0_i32_1 = arith.constant 0 : i32
    return %c0_i32, %c0_i32_0 : i32, i32
  }
  func.func @transform_9(%arg0: i32) -> (i32, i32) {
    %c0_i32 = arith.constant 0 : i32
    %c0_i32_0 = arith.constant 0 : i32
    %c0_i32_1 = arith.constant 0 : i32
    return %c0_i32, %c0_i32_0 : i32, i32
  }
  func.func @transform_10(%arg0: i32) -> (i32, i32) {
    %c0_i32 = arith.constant 0 : i32
    %c0_i32_0 = arith.constant 0 : i32
    %c0_i32_1 = arith.constant 0 : i32
    return %c0_i32, %c0_i32_0 : i32, i32
  }
  func.func @transform_11(%arg0: i32) -> (i32, i32) {
    %c0_i32 = arith.constant 0 : i32
    %c0_i32_0 = arith.constant 0 : i32
    %c0_i32_1 = arith.constant 0 : i32
    return %c0_i32, %c0_i32_0 : i32, i32
  }
  func.func @transform_12(%arg0: i32) -> (i32, i32) {
    %c0_i32 = arith.constant 0 : i32
    %c0_i32_0 = arith.constant 0 : i32
    %c0_i32_1 = arith.constant 0 : i32
    return %c0_i32, %c0_i32_0 : i32, i32
  }
  func.func @transform_13(%arg0: i32) -> (i32, i32) {
    %c0_i32 = arith.constant 0 : i32
    %c0_i32_0 = arith.constant 0 : i32
    %c0_i32_1 = arith.constant 0 : i32
    return %c0_i32, %c0_i32_0 : i32, i32
  }
  func.func @transform_14(%arg0: i32) -> (i32, i32) {
    %c0_i32 = arith.constant 0 : i32
    %c0_i32_0 = arith.constant 0 : i32
    %c0_i32_1 = arith.constant 0 : i32
    return %c0_i32, %c0_i32_0 : i32, i32
  }
  func.func @transform_15(%arg0: i32) -> (i32, i32) {
    %c0_i32 = arith.constant 0 : i32
    %c0_i32_0 = arith.constant 0 : i32
    %c0_i32_1 = arith.constant 0 : i32
    return %c0_i32, %c0_i32_0 : i32, i32
  }
  func.func @transform_16(%arg0: i32) -> (i32, i32) {
    %c0_i32 = arith.constant 0 : i32
    %c0_i32_0 = arith.constant 0 : i32
    %c0_i32_1 = arith.constant 0 : i32
    return %c0_i32, %c0_i32_0 : i32, i32
  }
  func.func @transform_17(%arg0: i32) -> (i32, i32) {
    %c0_i32 = arith.constant 0 : i32
    %c0_i32_0 = arith.constant 0 : i32
    %c0_i32_1 = arith.constant 0 : i32
    return %c0_i32, %c0_i32_0 : i32, i32
  }
  func.func @transform_18(%arg0: i32) -> (i32, i32) {
    %c0_i32 = arith.constant 0 : i32
    %c0_i32_0 = arith.constant 0 : i32
    %c0_i32_1 = arith.constant 0 : i32
    return %c0_i32, %c0_i32_0 : i32, i32
  }
  func.func @transform_19(%arg0: i32) -> (i32, i32) {
    %c0_i32 = arith.constant 0 : i32
    %c0_i32_0 = arith.constant 0 : i32
    return %arg0, %c0_i32 : i32, i32
  }
}

</mosaic_0001>

<bundles_post_ra>
// kernel: pnn_apply.1
= control target key start
LH: loop header
LB: loop body
LE: loop exit
PB: predicated region body
PF: predicated region fallthrough
CT: control target
= control target key end

     0   :  { %s3485_s0 = inlined_call_operand.vmem [shape: f32[16,4], index: 0, kind: input, shape index: {}]   ;;  %s3486_s1 = inlined_call_operand.vmem [shape: f32[2,128], index: 1, kind: input, shape index: {}]   ;;  %s3487_s2 = inlined_call_operand.vmem [shape: f32[1,128], index: 2, kind: input, shape index: {}]   ;;  %s3488_s3 = inlined_call_operand.vmem [shape: f32[2,128], index: 3, kind: input, shape index: {}]   ;;  %s3489_s4 = inlined_call_operand.vmem [shape: f32[1,2], index: 4, kind: input, shape index: {}]   ;;  %s3490_s5 = inlined_call_operand.vmem [shape: f32[4,256], index: 5, kind: input, shape index: {}]   ;;  %s3491_s6 = inlined_call_operand.vmem [shape: f32[1,256], index: 6, kind: input, shape index: {}]   ;;  %s3492_s7 = inlined_call_operand.hbm [shape: bf16[256,256], index: 7, kind: input, shape index: {}]   ;;  %s3493_s8 = inlined_call_operand.vmem [shape: f32[1,256], index: 8, kind: input, shape index: {}]   ;;  %s3494_s9 = inlined_call_operand.hbm [shape: bf16[256,256], index: 9, kind: input, shape index: {}]   ;;  %s3495_s10 = inlined_call_operand.vmem [shape: f32[1,256], index: 10, kind: input, shape index: {}]   ;;  %s3496_s11 = inlined_call_operand.hbm [shape: bf16[256,256], index: 11, kind: input, shape index: {}]   ;;  %s3497_s12 = inlined_call_operand.vmem [shape: f32[1,256], index: 12, kind: input, shape index: {}]   ;;  %s3498_s13 = inlined_call_operand.vmem [shape: f32[1,256], index: 13, kind: input, shape index: {}]   ;;  %s3499_s14 = inlined_call_operand.hbm [shape: bf16[256,256], index: 14, kind: input, shape index: {}]   ;;  %s3500_s15 = inlined_call_operand.hbm [shape: bf16[256,256], index: 15, kind: input, shape index: {}]   ;;  %s3501_s16 = inlined_call_operand.hbm [shape: bf16[256,256], index: 16, kind: input, shape index: {}]   ;;  %s3502_s17 = inlined_call_operand.vmem [shape: bf16[256,4], index: 17, kind: input, shape index: {}]   ;;  %s3503_s18 = inlined_call_operand.vmem [shape: f32[4,4], index: 18, kind: input, shape index: {}]   ;;  %s3504_s19 = inlined_call_operand.vmem [shape: f32[16,4], index: 19, kind: output, shape index: {}]  }
   0x1   :  { %3509 = sst [smem:[#allocation16_spill]] %s3485_s0 }
   0x2   :  { %3510 = sst [smem:[#allocation17_spill]] %s3486_s1 }
   0x3   :  { %3511 = sst [smem:[#allocation18_spill]] %s3487_s2 }
   0x4   :  { %3512 = sst [smem:[#allocation19_spill]] %s3488_s3 }
   0x5   :  { %24 = vsyncpa [#allocation3], 0 }
   0x6   :  { %25 = vsyncpa [#allocation5], 0 }
   0x7   :  { %26 = vsyncpa [#allocation8], 0 }
   0x8   :  { %27 = vsyncpa [#allocation11], 0  ;;  %s2960_s0 = smov [#allocation4]   ;;  %s2961_s20 = smov [#allocation7]  }
   0x9   :  { %s61_s30 = sshll.u32 %s2960_s0, 4  ;;  %s91_s21 = sshll.u32 %s2961_s20, 4  ;;  %s62_s30 = int_to_ptr.vmem [resolvable:$true] %s61_s30  ;;  %s3073_s21 = int_to_ptr.vmem [resolvable:$true] %s91_s21 }
   0xa   :  { %s2820_s2 = scalar_lea.hbm %s3494_s9, 4096 }
   0xb   :  { %p2821_p0 = scmp.ne.s32.totalorder %s3494_s9, %s2820_s2  ;;  %p2824_p1 = scmp.lt.u32.totalorder %s2820_s2, %s3494_s9 }
   0xd   :  { %p2826_p2 = pnand %p2824_p1, %p2821_p0 }
   0xf   :  { %2829 = shalt.err (!%p2826_p2)
}
  0x10   :  { %s2830_s26 = scalar_lea.vmem %s62_s30, 4096  ;;  %p2835_p4 = scmp.lt.s32.totalorder %s62_s30, %s62_s30 }
  0x11   :  { %p2831_p3 = scmp.ne.s32.totalorder %s62_s30, %s2830_s26  ;;  %p2836_p5 = scmp.lt.s32.totalorder %s2830_s26, %s2830_s26 }
  0x13   :  { %p2837_p6 = por %p2836_p5, %p2835_p4 }
  0x15   :  { %p2838_p7 = pnand %p2837_p6, %p2831_p3 }
  0x17   :  { %2841 = shalt.err (!%p2838_p7)
}
  0x18   :  { %s2962_s27 = smov 128   ;;  %s2963_s28 = smov 8  }
  0x19   :  { %67 = dma.hbm_to_vmem [thread:$0]  %s3494_s9, 4096, %s62_s30, [#allocation5], %s2962_s27, %s2962_s27, %s2963_s28  }
  0x1a   :  { %s2842_s22 = scalar_lea.hbm %s3499_s14, 4096 }
  0x1b   :  { %p2843_p8 = scmp.ne.s32.totalorder %s3499_s14, %s2842_s22  ;;  %p2846_p9 = scmp.lt.u32.totalorder %s2842_s22, %s3499_s14 }
  0x1d   :  { %p2848_p10 = pnand %p2846_p9, %p2843_p8 }
  0x1f   :  { %2851 = shalt.err (!%p2848_p10)
}
  0x20   :  { %s2852_s3 = scalar_lea.vmem %s3073_s21, 4096  ;;  %p2857_p12 = scmp.lt.s32.totalorder %s3073_s21, %s3073_s21 }
  0x21   :  { %p2853_p11 = scmp.ne.s32.totalorder %s3073_s21, %s2852_s3  ;;  %p2858_p13 = scmp.lt.s32.totalorder %s2852_s3, %s2852_s3 }
  0x23   :  { %p2859_p0 = por %p2858_p13, %p2857_p12 }
  0x25   :  { %p2860_p1 = pnand %p2859_p0, %p2853_p11 }
  0x27   :  { %2863 = shalt.err (!%p2860_p1)
}
  0x28   :  { %97 = dma.hbm_to_vmem [thread:$0]  %s3499_s14, 4096, %s3073_s21, [#allocation8], %s2962_s27, %s2962_s27, %s2963_s28  }
  0x29   :  { %s2964_s26 = smov [#allocation2]   ;;  %s2965_s0 = smov [#allocation6]  }
  0x2a   :  { %s47_s29 = sshll.u32 %s2964_s26, 4  ;;  %s75_s20 = sshll.u32 %s2965_s0, 4  ;;  %s48_s29 = int_to_ptr.vmem [resolvable:$true] %s47_s29  ;;  %s3110_s20 = int_to_ptr.vmem [resolvable:$true] %s75_s20 }
  0x2b   :  { %s2864_s2 = scalar_lea.hbm %s3492_s7, 4096 }
  0x2c   :  { %p2865_p2 = scmp.ne.s32.totalorder %s3492_s7, %s2864_s2  ;;  %p2868_p3 = scmp.lt.u32.totalorder %s2864_s2, %s3492_s7 }
  0x2e   :  { %p2870_p4 = pnand %p2868_p3, %p2865_p2 }
  0x30   :  { %2873 = shalt.err (!%p2870_p4)
}
  0x31   :  { %s2874_s14 = scalar_lea.vmem %s48_s29, 4096  ;;  %p2879_p6 = scmp.lt.s32.totalorder %s48_s29, %s48_s29 }
  0x32   :  { %p2875_p5 = scmp.ne.s32.totalorder %s48_s29, %s2874_s14  ;;  %p2880_p7 = scmp.lt.s32.totalorder %s2874_s14, %s2874_s14 }
  0x34   :  { %p2881_p8 = por %p2880_p7, %p2879_p6 }
  0x36   :  { %p2882_p9 = pnand %p2881_p8, %p2875_p5 }
  0x38   :  { %2885 = shalt.err (!%p2882_p9)
}
  0x39   :  { %53 = dma.hbm_to_vmem [thread:$0]  %s3492_s7, 4096, %s48_s29, [#allocation3], %s2962_s27, %s2962_s27, %s2963_s28  }
  0x3a   :  { %s2886_s0 = scalar_lea.hbm %s3496_s11, 4096 }
  0x3b   :  { %p2887_p10 = scmp.ne.s32.totalorder %s3496_s11, %s2886_s0  ;;  %p2890_p11 = scmp.lt.u32.totalorder %s2886_s0, %s3496_s11 }
  0x3d   :  { %p2892_p12 = pnand %p2890_p11, %p2887_p10 }
  0x3f   :  { %2895 = shalt.err (!%p2892_p12)
}
  0x40   :  { %s2896_s24 = scalar_lea.vmem %s3110_s20, 4096  ;;  %p2901_p0 = scmp.lt.s32.totalorder %s3110_s20, %s3110_s20 }
  0x41   :  { %p2897_p13 = scmp.ne.s32.totalorder %s3110_s20, %s2896_s24  ;;  %p2902_p1 = scmp.lt.s32.totalorder %s2896_s24, %s2896_s24 }
  0x43   :  { %p2903_p2 = por %p2902_p1, %p2901_p0 }
  0x45   :  { %p2904_p3 = pnand %p2903_p2, %p2897_p13 }
  0x47   :  { %2907 = shalt.err (!%p2904_p3)
}
  0x48   :  { %81 = dma.hbm_to_vmem [thread:$0]  %s3496_s11, 4096, %s3110_s20, [#allocation5], %s2962_s27, %s2962_s27, %s2963_s28  }
  0x49   :  { %s2966_s25 = smov [#allocation9]   ;;  %s2967_s14 = smov [#allocation10]  }
  0x4a   :  { %s103_s3 = sshll.u32 %s2966_s25, 4  ;;  %s115_s21 = sshll.u32 %s2967_s14, 4  ;;  %s104_s3 = int_to_ptr.vmem [resolvable:$true] %s103_s3  ;;  %s3147_s21 = int_to_ptr.vmem [resolvable:$true] %s115_s21 }
  0x4b   :  { %s2908_s26 = scalar_lea.hbm %s3500_s15, 4096 }
  0x4c   :  { %p2909_p4 = scmp.ne.s32.totalorder %s3500_s15, %s2908_s26  ;;  %p2912_p5 = scmp.lt.u32.totalorder %s2908_s26, %s3500_s15 }
  0x4e   :  { %p2914_p6 = pnand %p2912_p5, %p2909_p4 }
  0x50   :  { %2917 = shalt.err (!%p2914_p6)
}
  0x51   :  { %s2918_s11 = scalar_lea.vmem %s104_s3, 4096  ;;  %p2923_p8 = scmp.lt.s32.totalorder %s104_s3, %s104_s3 }
  0x52   :  { %p2919_p7 = scmp.ne.s32.totalorder %s104_s3, %s2918_s11  ;;  %p2924_p9 = scmp.lt.s32.totalorder %s2918_s11, %s2918_s11 }
  0x54   :  { %p2925_p10 = por %p2924_p9, %p2923_p8 }
  0x56   :  { %p2926_p11 = pnand %p2925_p10, %p2919_p7 }
  0x58   :  { %2929 = shalt.err (!%p2926_p11)
}
  0x59   :  { %109 = dma.hbm_to_vmem [thread:$0]  %s3500_s15, 4096, %s104_s3, [#allocation8], %s2962_s27, %s2962_s27, %s2963_s28  }
  0x5a   :  { %s2930_s29 = scalar_lea.hbm %s3501_s16, 4096 }
  0x5b   :  { %p2931_p12 = scmp.ne.s32.totalorder %s3501_s16, %s2930_s29  ;;  %p2934_p13 = scmp.lt.u32.totalorder %s2930_s29, %s3501_s16 }
  0x5d   :  { %p2936_p0 = pnand %p2934_p13, %p2931_p12 }
  0x5f   :  { %2939 = shalt.err (!%p2936_p0)
}
  0x60   :  { %s2940_s26 = scalar_lea.vmem %s3147_s21, 4096  ;;  %p2945_p2 = scmp.lt.s32.totalorder %s3147_s21, %s3147_s21 }
  0x61   :  { %p2941_p1 = scmp.ne.s32.totalorder %s3147_s21, %s2940_s26  ;;  %p2946_p3 = scmp.lt.s32.totalorder %s2940_s26, %s2940_s26 }
  0x63   :  { %p2947_p4 = por %p2946_p3, %p2945_p2 }
  0x65   :  { %p2948_p5 = pnand %p2947_p4, %p2941_p1 }
  0x67   :  { %2951 = shalt.err (!%p2948_p5)
}
  0x68   :  { %121 = dma.hbm_to_vmem [thread:$0]  %s3501_s16, 4096, %s3147_s21, [#allocation11], %s2962_s27, %s2962_s27, %s2963_s28  }
  0x69   :  { %2952 = dma.done.wait [#allocation3], 4096  }
  0x6a   :  { %2953 = vsyncadd [#allocation3], 4294963200 }
  0x6b   :  { %2954 = dma.done.wait [#allocation5], 8192  }
  0x6c   :  { %2955 = vsyncadd [#allocation5], 4294959104 }
  0x6d   :  { %2956 = dma.done.wait [#allocation8], 8192  }
  0x6e   :  { %2957 = vsyncadd [#allocation8], 4294959104 }
  0x6f   :  { %2958 = dma.done.wait [#allocation11], 4096  }
  0x70   :  { %2959 = vsyncadd [#allocation11], 4294963200  ;;  %v2968_v0 = vmov 1   ;;  %v2969_v1 = vmov 0   ;;  %s3513_s22 = sld [smem:[#allocation16_spill]]  ;;  %s3514_s2 = sld [smem:[#allocation17_spill]] }
  0x71   :  { %2459 = vset.pattern.permute.xlu1 %v2968_v0  ;;  %2458 = vset.pattern.permute.xlu0 %v2969_v1  ;;  %s3515_s7 = sld [smem:[#allocation18_spill]]  ;;  %s3516_s14 = sld [smem:[#allocation19_spill]]  ;;  %v2206_v27 = vld [vmem:[%s3489_s4] ss:$0 sm:$0xff]  ;;  %v2470_v36 = vld [vmem:[#allocation2 + $0x4] ss:$8 sps:$4 sm:$0xff]  }
  0x72   :  { %s2970_s3 = smov 2   ;;  %v2472_v37 = vld [vmem:[#allocation2] ss:$8 sps:$4 sm:$0xff]   ;;  %v2473_v38 = vld [vmem:[#allocation2 + $0x14] ss:$8 sps:$4 sm:$0xff]   ;;  %590 = vmatprep.subr.bf16.mxu0 %v2470_v36  ;;  %vm245_vm0 = vcmask 15360  }
  0x73   :  { %591 = vmatpush1.bf16.msra.mxu0 %v2472_v37  ;;  %v2475_v39 = vld [vmem:[#allocation2 + $0x10] ss:$8 sps:$4 sm:$0xff]   ;;  %v2476_v40 = vld [vmem:[#allocation2 + $0x24] ss:$8 sps:$4 sm:$0xff]   ;;  %v2478_v41 = vld [vmem:[#allocation2 + $0x20] ss:$8 sps:$4 sm:$0xff]  }
  0x74   :  { %592 = vmatprep.subr.bf16.mxu0 %v2473_v38  ;;  %v2479_v42 = vld [vmem:[#allocation2 + $0x34] ss:$8 sps:$4 sm:$0xff]   ;;  %v2481_v43 = vld [vmem:[#allocation2 + $0x30] ss:$8 sps:$4 sm:$0xff]   ;;  %v2482_v44 = vld [vmem:[#allocation2 + $0x44] ss:$8 sps:$4 sm:$0xff]  }
  0x75   :  { %v2484_v45 = vld [vmem:[#allocation2 + $0x40] ss:$8 sps:$4 sm:$0xff]   ;;  %v2485_v46 = vld [vmem:[#allocation2 + $0x54] ss:$8 sps:$4 sm:$0xff]   ;;  %vm248_vm1 = vcmask 23552   ;;  %vm2191_vm2 = vcmask 31744  }
  0x76   :  { %v3189_v2 = vld [vmem:[%s3513_s22] sm:$0xff]  ;;  %v3196_v3 = vld [vmem:[%s3513_s22 + $0x8] sm:$0xff]  ;;  %v2487_v54 = vld [vmem:[#allocation2 + $0x50] ss:$8 sps:$4 sm:$0xff]  }
  0x77   :  { %166 = vperm.xlu1 %2459, %v3189_v2   ;;  %150 = vperm.xlu0 %2458, %v3189_v2   ;;  %v2203_v4 = vld [vmem:[%s3514_s2 + $0x1] ss:$0 sm:$0xff]  ;;  %v2202_v5 = vld [vmem:[%s3514_s2] ss:$0 sm:$0xff]  ;;  %v2488_v57 = vld [vmem:[#allocation2 + $0x64] ss:$8 sps:$4 sm:$0xff]  }
  0x78   :  { %v2204_v10 = vld [vmem:[%s3515_s7] ss:$0 sm:$0xff]  ;;  %v2207_v22 = vld [vmem:[%s3516_s14 + $0x1] ss:$0 sm:$0xff]  ;;  %593 = vmatpush1.bf16.msra.mxu0 %v2475_v39  ;;  %v2491_v62 = vld [vmem:[#allocation2 + $0x74] ss:$8 sps:$4 sm:$0xff]  }
  0x79   :  { %v2205_v19 = vld [vmem:[%s3516_s14] ss:$0 sm:$0xff]  ;;  %594 = vmatprep.subr.bf16.mxu0 %v2476_v40  ;;  %v2493_v63 = vld [vmem:[#allocation2 + $0x70] ss:$8 sps:$4 sm:$0xff]   ;;  %v2545_v37 = vld [vmem:[#allocation4 + $0x94] ss:$8 sps:$4 sm:$0xff]  }
  0x7a   :  { %v2490_v60 = vld [vmem:[#allocation2 + $0x60] ss:$8 sps:$4 sm:$0xff]   ;;  %v2547_v38 = vld [vmem:[#allocation4 + $0x90] ss:$8 sps:$4 sm:$0xff]   ;;  %v2548_v39 = vld [vmem:[#allocation4 + $0xa4] ss:$8 sps:$4 sm:$0xff]  }
  0x7b   :  { %170 = vperm.xlu1 %2459, %v3196_v3   ;;  %155 = vperm.xlu0 %2458, %v3196_v3   ;;  %v2544_v36 = vld [vmem:[#allocation4 + $0x80] ss:$8 sps:$4 sm:$0xff]  }
  0x7c   :  { %595 = vmatpush1.bf16.msra.mxu0 %v2478_v41  ;;  %v2550_v40 = vld [vmem:[#allocation4 + $0xa0] ss:$8 sps:$4 sm:$0xff]   ;;  %v263_v41 = vlaneseq }
  0x7d   :  { %596 = vmatprep.subr.bf16.mxu0 %v2479_v42 }
  0x7f   :  { %2460 = vset.pattern.permute.xlu1 %v2969_v1 }
  0x80   :  { %597 = vmatpush1.bf16.msra.mxu0 %v2481_v43  ;;  %v264_v43 = vshrl.u32 %v263_v41, 7 }
  0x81   :  { %598 = vmatprep.subr.bf16.mxu0 %v2482_v44  ;;  %v2419_v44 = vld [vmem:[%s3503_s18] ss:$0 sm:$0xff] }
  0x84   :  { %599 = vmatpush1.bf16.msra.mxu0 %v2484_v45  ;;  %v2420_v45 = vld [vmem:[%s3503_s18 + $0x1] ss:$0 sm:$0xff] }
  0x85   :  { %600 = vmatprep.subr.bf16.mxu0 %v2485_v46 }
  0x88   :  { %601 = vmatpush1.bf16.msra.mxu0 %v2487_v54 }
  0x89   :  { %602 = vmatprep.subr.bf16.mxu0 %v2488_v57 }
  0x8c   :  { %603 = vmatpush1.bf16.msra.mxu0 %v2490_v60 }
  0x8d   :  { %604 = vmatprep.subr.bf16.mxu0 %v2491_v62 }
  0x90   :  { %605 = vmatpush1.bf16.msra.mxu0 %v2493_v63  ;;  %v2209_v63 = vld [vmem:[%s3490_s5 + $0x2] ss:$4 sm:$0x3] }
  0xf6   :  { %v167_v6 = vpop.permute.xlu1 %166  ;;  %v151_v7 = vpop.permute.xlu0 %150 }
  0xf7   :  { %v177_v8 = vmul.f32 %v2203_v4, %v167_v6  ;;  %v162_v9 = vmul.f32 %v2202_v5, %v151_v7  ;;  %v2499_v6 = vld [vmem:[#allocation2 + $0x90] ss:$8 sps:$4 sm:$0xff]   ;;  %v2972_v7 = vmov 3  }
  0xf9   :  { %v179_v11 = vadd.f32 %v177_v8, %v162_v9  ;;  %v2500_v8 = vld [vmem:[#allocation2 + $0xa4] ss:$8 sps:$4 sm:$0xff]   ;;  %v2502_v9 = vld [vmem:[#allocation2 + $0xa0] ss:$8 sps:$4 sm:$0xff]  }
  0xfa   :  { %v171_v12 = vpop.permute.xlu1 %170  ;;  %v156_v13 = vpop.permute.xlu0 %155 }
  0xfb   :  { %v188_v14 = vadd.f32 %v2204_v10, %v179_v11  ;;  %v178_v15 = vmul.f32 %v2203_v4, %v171_v12  ;;  %v163_v16 = vmul.f32 %v2202_v5, %v156_v13  ;;  %v2496_v4 = vld [vmem:[#allocation2 + $0x80] ss:$8 sps:$4 sm:$0xff]   ;;  %v2497_v5 = vld [vmem:[#allocation2 + $0x94] ss:$8 sps:$4 sm:$0xff]   ;;  %v2505_v11 = vld [vmem:[#allocation2 + $0xb0] ss:$8 sps:$4 sm:$0xff]  }
  0xfc   :  { %v2506_v12 = vld [vmem:[#allocation2 + $0xc4] ss:$8 sps:$4 sm:$0xff]   ;;  %v2508_v13 = vld [vmem:[#allocation2 + $0xc0] ss:$8 sps:$4 sm:$0xff]  }
  0xfd   :  { %2774 = vtanh.f32 %v188_v14  ;;  %v180_v17 = vadd.f32 %v178_v15, %v163_v16  ;;  %v2509_v14 = vld [vmem:[#allocation2 + $0xd4] ss:$8 sps:$4 sm:$0xff]   ;;  %v2511_v15 = vld [vmem:[#allocation2 + $0xd0] ss:$8 sps:$4 sm:$0xff]   ;;  %v2512_v16 = vld [vmem:[#allocation2 + $0xe4] ss:$8 sps:$4 sm:$0xff]  }
  0xff   :  { %v189_v18 = vadd.f32 %v2204_v10, %v180_v17  ;;  %v2503_v10 = vld [vmem:[#allocation2 + $0xb4] ss:$8 sps:$4 sm:$0xff]   ;;  %v2514_v17 = vld [vmem:[#allocation2 + $0xe0] ss:$8 sps:$4 sm:$0xff]  }
 0x101   :  { %2776 = vtanh.f32 %v189_v18  ;;  %v2515_v18 = vld [vmem:[#allocation2 + $0xf4] ss:$8 sps:$4 sm:$0xff]  }
 0x107   :  { %v2775_v20 = vpop.eup %2774 }
 0x108   :  { %v197_v21 = vmul.f32 %v2775_v20, %v2205_v19  ;;  %v217_v24 = vmul.f32 %v2775_v20, %v2207_v22  ;;  %v2518_v20 = vld [vmem:[#allocation4 + $0x4] ss:$8 sps:$4 sm:$0xff]  }
 0x109   :  { %843 = vmatprep.subr.bf16.mxu1 %v2518_v20 }
 0x10a   :  { %199 = vadd.xlane.f32.xlu0 %v197_v21  ;;  %v2520_v21 = vld [vmem:[#allocation4] ss:$8 sps:$4 sm:$0xff]  }
 0x10b   :  { %v2777_v23 = vpop.eup %2776  ;;  %844 = vmatpush1.bf16.msra.mxu1 %v2520_v21 }
 0x10c   :  { %v198_v25 = vmul.f32 %v2777_v23, %v2205_v19  ;;  %v218_v26 = vmul.f32 %v2777_v23, %v2207_v22  ;;  %v2517_v19 = vld [vmem:[#allocation2 + $0xf0] ss:$8 sps:$4 sm:$0xff]   ;;  %v2521_v22 = vld [vmem:[#allocation4 + $0x14] ss:$8 sps:$4 sm:$0xff]   ;;  %v2524_v23 = vld [vmem:[#allocation4 + $0x24] ss:$8 sps:$4 sm:$0xff]  }
 0x10d   :  { %845 = vmatprep.subr.bf16.mxu1 %v2521_v22 }
 0x10e   :  { %219 = vadd.xlane.f32.xlu0 %v217_v24  ;;  %201 = vadd.xlane.f32.xlu1 %v198_v25  ;;  %v2526_v24 = vld [vmem:[#allocation4 + $0x20] ss:$8 sps:$4 sm:$0xff]   ;;  %v2527_v25 = vld [vmem:[#allocation4 + $0x34] ss:$8 sps:$4 sm:$0xff]  }
 0x112   :  { %221 = vadd.xlane.f32.xlu0 %v218_v26  ;;  %v2529_v26 = vld [vmem:[#allocation4 + $0x30] ss:$8 sps:$4 sm:$0xff]  }
 0x197   :  { %v200_v28 = vpop.xlane.xlu0 %199 }
 0x198   :  { %v210_v29 = vadd.f32 %v2206_v27, %v200_v28  ;;  %v2532_v28 = vld [vmem:[#allocation4 + $0x40] ss:$8 sps:$4 sm:$0xff]  }
 0x19a   :  { %227 = vrot.lane.b32.xlu1 %v210_v29, %s2970_s3  ;;  %v2533_v29 = vld [vmem:[#allocation4 + $0x54] ss:$8 sps:$4 sm:$0xff]  }
 0x19b   :  { %v202_v30 = vpop.xlane.xlu1 %201  ;;  %v220_v31 = vpop.xlane.xlu0 %219 }
 0x19c   :  { %v211_v32 = vadd.f32 %v2206_v27, %v202_v30  ;;  %v223_v33 = vadd.f32 %v2206_v27, %v220_v31  ;;  %v2535_v30 = vld [vmem:[#allocation4 + $0x50] ss:$8 sps:$4 sm:$0xff]   ;;  %v2536_v31 = vld [vmem:[#allocation4 + $0x64] ss:$8 sps:$4 sm:$0xff]  }
 0x19e   :  { %229 = vrot.lane.b32.xlu0 %v211_v32, %s2970_s3  ;;  %237 = vrot.lane.b32.xlu1 %v223_v33, %s2970_s3  ;;  %v2538_v32 = vld [vmem:[#allocation4 + $0x60] ss:$8 sps:$4 sm:$0xff]   ;;  %v2539_v33 = vld [vmem:[#allocation4 + $0x74] ss:$8 sps:$4 sm:$0xff]  }
 0x19f   :  { %v222_v34 = vpop.xlane.xlu0 %221 }
 0x1a0   :  { %v224_v35 = vadd.f32 %v2206_v27, %v222_v34  ;;  %v2530_v27 = vld [vmem:[#allocation4 + $0x44] ss:$8 sps:$4 sm:$0xff]   ;;  %v2541_v34 = vld [vmem:[#allocation4 + $0x70] ss:$8 sps:$4 sm:$0xff]  }
 0x1a2   :  { %239 = vrot.lane.b32.xlu1 %v224_v35, %s2970_s3  ;;  %v2542_v35 = vld [vmem:[#allocation4 + $0x84] ss:$8 sps:$4 sm:$0xff]  }
 0x20c   :  { %v228_v47 = vpop.permute.xlu1 %227 }
 0x20d   :  { %v233_v48 = vadd.f32 %v228_v47, %v3189_v2 }
 0x20f   :  { %v246_v52 = vsel %vm245_vm0, %v3189_v2, %v233_v48  ;;  %v3255_v48 = vsub.s32 0, %v264_v43 }
 0x210   :  { %v238_v49 = vpop.permute.xlu1 %237  ;;  %v230_v50 = vpop.permute.xlu0 %229 }
 0x211   :  { %v243_v51 = vadd.f32 %v238_v49, %v3189_v2  ;;  %v234_v53 = vadd.f32 %v230_v50, %v3196_v3  ;;  %v2971_v2 = vmov 2   ;;  %v2208_v50 = vld [vmem:[%s3490_s5 + $0x1] ss:$4 sm:$0x3] }
 0x213   :  { %v3229_v55 = vsel %vm248_vm1, %v246_v52, %v243_v51  ;;  %v247_v59 = vsel %vm245_vm0, %v3196_v3, %v234_v53  ;;  %v251_v52 = vld [vmem:[%s3490_s5] ss:$4 sm:$0x3]  ;;  %v3263_v53 = vsub.s32 1, %v264_v43 }
 0x214   :  { %254 = vperm.xlu0 %2458, %v3229_v55   ;;  %v240_v56 = vpop.permute.xlu1 %239 }
 0x215   :  { %v244_v58 = vadd.f32 %v240_v56, %v3196_v3  ;;  %v2494_v3 = vld [vmem:[#allocation2 + $0x84] ss:$8 sps:$4 sm:$0xff]   ;;  %v291_v56 = vrot.slane %v2208_v50, %v3255_v48  ;;  %v295_v60 = vrot.slane %v2208_v50, %v3263_v53 }
 0x216   :  { %606 = vmatprep.subr.bf16.mxu0 %v2494_v3 }
 0x217   :  { %v3236_v61 = vsel %vm248_vm1, %v247_v59, %v244_v58  ;;  %607 = vmatpush1.bf16.msra.mxu0 %v2496_v4  ;;  %v266_v58 = vrot.slane %v251_v52, %v3255_v48 }
 0x218   :  { %2461 = vset.pattern.permute.xlu0 %v2968_v0  ;;  %259 = vperm.xlu1 %2460, %v3236_v61  }
 0x219   :  { %280 = vperm.xlu0 %2461, %v3229_v55   ;;  %608 = vmatprep.subr.bf16.mxu0 %v2497_v5  ;;  %v320_v5 = vrot.slane %v2209_v63, %v3255_v48 }
 0x21b   :  { %609 = vmatpush1.bf16.msra.mxu0 %v2499_v6  ;;  %v2210_v6 = vld [vmem:[%s3490_s5 + $0x3] ss:$4 sm:$0x3] }
 0x21c   :  { %2462 = vset.pattern.permute.xlu1 %v2968_v0  ;;  %610 = vmatprep.subr.bf16.mxu0 %v2500_v8  ;;  %v349_v20 = vrot.slane %v2210_v6, %v3255_v48  ;;  %v353_v21 = vrot.slane %v2210_v6, %v3263_v53  ;;  %v2557_v6 = vld [vmem:[#allocation4 + $0xd4] ss:$8 sps:$4 sm:$0xff]  }
 0x21d   :  { %2464 = vset.pattern.permute.xlu0 %v2971_v2  ;;  %284 = vperm.xlu1 %2462, %v3236_v61  }
 0x21e   :  { %313 = vperm.xlu0 %2464, %v3236_v61  }
 0x21f   :  { %611 = vmatpush1.bf16.msra.mxu0 %v2502_v9  ;;  %v324_v9 = vrot.slane %v2209_v63, %v3263_v53  ;;  %v2551_v63 = vld [vmem:[#allocation4 + $0xb4] ss:$8 sps:$4 sm:$0xff]  }
 0x220   :  { %612 = vmatprep.subr.bf16.mxu0 %v2503_v10  ;;  %v3282_v10 = vld [vmem:[%s3503_s18 + $0x2] ss:$0 sm:$0xff] }
 0x221   :  { %2463 = vset.pattern.permute.xlu1 %v2971_v2  ;;  %v270_v2 = vrot.slane %v251_v52, %v3263_v53 }
 0x222   :  { %309 = vperm.xlu1 %2463, %v3229_v55   ;;  %2466 = vset.pattern.permute.xlu0 %v2969_v1 }
 0x223   :  { %613 = vmatpush1.bf16.msra.mxu0 %v2505_v11 }
 0x224   :  { %614 = vmatprep.subr.bf16.mxu0 %v2506_v12 }
 0x226   :  { %2465 = vset.pattern.permute.xlu1 %v2972_v7 }
 0x227   :  { %338 = vperm.xlu1 %2465, %v3229_v55   ;;  %615 = vmatpush1.bf16.msra.mxu0 %v2508_v13 }
 0x228   :  { %616 = vmatprep.subr.bf16.mxu0 %v2509_v14 }
 0x22b   :  { %342 = vperm.xlu1 %2465, %v3236_v61   ;;  %617 = vmatpush1.bf16.msra.mxu0 %v2511_v15 }
 0x22c   :  { %618 = vmatprep.subr.bf16.mxu0 %v2512_v16 }
 0x22f   :  { %2467 = vset.pattern.permute.xlu1 %v2969_v1  ;;  %619 = vmatpush1.bf16.msra.mxu0 %v2514_v17  ;;  %v2523_v1 = vld [vmem:[#allocation4 + $0x10] ss:$8 sps:$4 sm:$0xff]   ;;  %v364_v17 = vld [vmem:[%s3491_s6] sm:$0x3] }
 0x230   :  { %620 = vmatprep.subr.bf16.mxu0 %v2515_v18  ;;  %846 = vmatpush1.bf16.msra.mxu1 %v2523_v1 }
 0x231   :  { %847 = vmatprep.subr.bf16.mxu1 %v2524_v23 }
 0x233   :  { %621 = vmatpush1.bf16.msra.mxu0 %v2517_v19 }
 0x234   :  { %848 = vmatpush1.bf16.msra.mxu1 %v2526_v24 }
 0x235   :  { %849 = vmatprep.subr.bf16.mxu1 %v2527_v25  ;;  %v3295_v25 = vld [vmem:[%s3503_s18 + $0x3] ss:$0 sm:$0xff] }
 0x238   :  { %850 = vmatpush1.bf16.msra.mxu1 %v2529_v26 }
 0x239   :  { %851 = vmatprep.subr.bf16.mxu1 %v2530_v27 }
 0x23c   :  { %852 = vmatpush1.bf16.msra.mxu1 %v2532_v28  ;;  %v369_v28 = vrot.slane %v364_v17, %v3255_v48 }
 0x23d   :  { %853 = vmatprep.subr.bf16.mxu1 %v2533_v29 }
 0x240   :  { %854 = vmatpush1.bf16.msra.mxu1 %v2535_v30 }
 0x241   :  { %855 = vmatprep.subr.bf16.mxu1 %v2536_v31 }
 0x244   :  { %856 = vmatpush1.bf16.msra.mxu1 %v2538_v32 }
 0x245   :  { %857 = vmatprep.subr.bf16.mxu1 %v2539_v33 }
 0x248   :  { %858 = vmatpush1.bf16.msra.mxu1 %v2541_v34 }
 0x249   :  { %859 = vmatprep.subr.bf16.mxu1 %v2542_v35 }
 0x24c   :  { %860 = vmatpush1.bf16.msra.mxu1 %v2544_v36 }
 0x24d   :  { %861 = vmatprep.subr.bf16.mxu1 %v2545_v37 }
 0x250   :  { %862 = vmatpush1.bf16.msra.mxu1 %v2547_v38  ;;  %v373_v38 = vrot.slane %v364_v17, %v3263_v53  ;;  %v2569_v17 = vld [vmem:[#allocation6 + $0x10] ss:$8 sps:$4 sm:$0xff]  }
 0x251   :  { %863 = vmatprep.subr.bf16.mxu1 %v2548_v39 }
 0x254   :  { %864 = vmatpush1.bf16.msra.mxu1 %v2550_v40 }
 0x255   :  { %865 = vmatprep.subr.bf16.mxu1 %v2551_v63  ;;  %v2601_v63 = vld [vmem:[#allocation6 + $0xb4] ss:$8 sps:$4 sm:$0xff]  }
 0x293   :  { %v255_v42 = vpop.permute.xlu0 %254 }
 0x294   :  { %v2090_v49 = vmul.f32 %v2419_v44, %v255_v42  ;;  %v273_v7 = vmul.f32 %v266_v58, %v255_v42  ;;  %v274_v18 = vmul.f32 %v270_v2, %v255_v42 }
 0x297   :  { %v260_v46 = vpop.permute.xlu1 %259 }
 0x298   :  { %v281_v47 = vpop.permute.xlu0 %280  ;;  %v2091_v59 = vmul.f32 %v2419_v44, %v260_v46  ;;  %v275_v22 = vmul.f32 %v266_v58, %v260_v46  ;;  %v276_v1 = vmul.f32 %v270_v2, %v260_v46  ;;  %v2553_v2 = vld [vmem:[#allocation4 + $0xb0] ss:$8 sps:$4 sm:$0xff]  }
 0x299   :  { %v2097_v51 = vmul.f32 %v2420_v45, %v281_v47  ;;  %v298_v4 = vmul.f32 %v291_v56, %v281_v47  ;;  %v299_v8 = vmul.f32 %v295_v60, %v281_v47  ;;  %866 = vmatpush1.bf16.msra.mxu1 %v2553_v2  ;;  %v2599_v2 = vld [vmem:[#allocation6 + $0xb0] ss:$8 sps:$4 sm:$0xff]  }
 0x29b   :  { %v2099_v54 = vadd.f32 %v2097_v51, %v2090_v49  ;;  %v302_v23 = vadd.f32 %v298_v4, %v273_v7  ;;  %v303_v26 = vadd.f32 %v299_v8, %v274_v18  ;;  %v2554_v4 = vld [vmem:[#allocation4 + $0xc4] ss:$8 sps:$4 sm:$0xff]   ;;  %v2559_v7 = vld [vmem:[#allocation4 + $0xd0] ss:$8 sps:$4 sm:$0xff]  }
 0x29c   :  { %v285_v57 = vpop.permute.xlu1 %284  ;;  %867 = vmatprep.subr.bf16.mxu1 %v2554_v4  ;;  %v2560_v8 = vld [vmem:[#allocation4 + $0xe4] ss:$8 sps:$4 sm:$0xff]  }
 0x29d   :  { %v2098_v62 = vmul.f32 %v2420_v45, %v285_v57  ;;  %v300_v12 = vmul.f32 %v291_v56, %v285_v57  ;;  %v301_v13 = vmul.f32 %v295_v60, %v285_v57  ;;  %v3284_v14 = vpop.permute.xlu0 %313  ;;  %v2574_v18 = vld [vmem:[#allocation6 + $0x24] ss:$8 sps:$4 sm:$0xff]  }
 0x29e   :  { %v329_v27 = vmul.f32 %v320_v5, %v3284_v14  ;;  %v330_v31 = vmul.f32 %v324_v9, %v3284_v14  ;;  %v2604_v4 = vld [vmem:[#allocation6 + $0xc4] ss:$8 sps:$4 sm:$0xff]  }
 0x29f   :  { %v3272_v3 = vadd.f32 %v2098_v62, %v2091_v59  ;;  %v304_v29 = vadd.f32 %v300_v12, %v275_v22  ;;  %v305_v30 = vadd.f32 %v301_v13, %v276_v1  ;;  %v2565_v12 = vld [vmem:[#allocation4 + $0xf0] ss:$8 sps:$4 sm:$0xff]   ;;  %v2566_v13 = vld [vmem:[#allocation6] ss:$8 sps:$4 sm:$0xff]   ;;  %v2580_v22 = vld [vmem:[#allocation6 + $0x44] ss:$8 sps:$4 sm:$0xff]  }
 0x2a0   :  { %v2578_v1 = vld [vmem:[#allocation6 + $0x40] ss:$8 sps:$4 sm:$0xff]  }
 0x2a1   :  { %v310_v11 = vpop.permute.xlu1 %309  ;;  %v333_v42 = vadd.f32 %v329_v27, %v304_v29  ;;  %v334_v44 = vadd.f32 %v330_v31, %v305_v30  ;;  %v2584_v27 = vld [vmem:[#allocation6 + $0x60] ss:$8 sps:$4 sm:$0xff]   ;;  %v2587_v29 = vld [vmem:[#allocation6 + $0x70] ss:$8 sps:$4 sm:$0xff]   ;;  %v2592_v30 = vld [vmem:[#allocation6 + $0x84] ss:$8 sps:$4 sm:$0xff]  }
 0x2a2   :  { %v327_v15 = vmul.f32 %v320_v5, %v310_v11  ;;  %v2106_v16 = vmul.f32 %v3282_v10, %v310_v11  ;;  %v328_v19 = vmul.f32 %v324_v9, %v310_v11  ;;  %v2556_v5 = vld [vmem:[#allocation4 + $0xc0] ss:$8 sps:$4 sm:$0xff]   ;;  %v2563_v11 = vld [vmem:[#allocation4 + $0xf4] ss:$8 sps:$4 sm:$0xff]  }
 0x2a3   :  { %868 = vmatpush1.bf16.msra.mxu1 %v2556_v5  ;;  %v2562_v9 = vld [vmem:[#allocation4 + $0xe0] ss:$8 sps:$4 sm:$0xff]  }
 0x2a4   :  { %v2108_v24 = vadd.f32 %v2106_v16, %v2099_v54  ;;  %v331_v32 = vadd.f32 %v327_v15, %v302_v23  ;;  %v332_v34 = vadd.f32 %v328_v19, %v303_v26  ;;  %869 = vmatprep.subr.bf16.mxu1 %v2557_v6  ;;  %v2568_v15 = vld [vmem:[#allocation6 + $0x4] ss:$8 sps:$4 sm:$0xff]   ;;  %v2571_v16 = vld [vmem:[#allocation6 + $0x14] ss:$8 sps:$4 sm:$0xff]   ;;  %v2572_v19 = vld [vmem:[#allocation6 + $0x20] ss:$8 sps:$4 sm:$0xff]  }
 0x2a5   :  { %1096 = vmatprep.subr.bf16.mxu0 %v2568_v15  ;;  %v2583_v23 = vld [vmem:[#allocation6 + $0x54] ss:$8 sps:$4 sm:$0xff]   ;;  %v2586_v26 = vld [vmem:[#allocation6 + $0x64] ss:$8 sps:$4 sm:$0xff]   ;;  %v2590_v31 = vld [vmem:[#allocation6 + $0x80] ss:$8 sps:$4 sm:$0xff]  }
 0x2a6   :  { %v339_v33 = vpop.permute.xlu1 %338  ;;  %v2602_v5 = vld [vmem:[#allocation6 + $0xc0] ss:$8 sps:$4 sm:$0xff]   ;;  %v2605_v6 = vld [vmem:[#allocation6 + $0xd0] ss:$8 sps:$4 sm:$0xff]   ;;  %v2616_v15 = vld [vmem:[#allocation7 + $0x4] ss:$8 sps:$4 sm:$0xff]  }
 0x2a7   :  { %v356_v35 = vmul.f32 %v349_v20, %v339_v33  ;;  %v357_v36 = vmul.f32 %v353_v21, %v339_v33  ;;  %v2115_v37 = vmul.f32 %v3295_v25, %v339_v33  ;;  %870 = vmatpush1.bf16.msra.mxu1 %v2559_v7  ;;  %v2593_v33 = vld [vmem:[#allocation6 + $0x90] ss:$8 sps:$4 sm:$0xff]   ;;  %v2607_v7 = vld [vmem:[#allocation6 + $0xd4] ss:$8 sps:$4 sm:$0xff]  }
 0x2a8   :  { %871 = vmatprep.subr.bf16.mxu1 %v2560_v8  ;;  %v2610_v8 = vld [vmem:[#allocation6 + $0xe4] ss:$8 sps:$4 sm:$0xff]  }
 0x2a9   :  { %v360_v39 = vadd.f32 %v356_v35, %v331_v32  ;;  %v361_v40 = vadd.f32 %v357_v36, %v332_v34  ;;  %v3302_v41 = vadd.f32 %v2115_v37, %v2108_v24  ;;  %v2581_v24 = vld [vmem:[#allocation6 + $0x50] ss:$8 sps:$4 sm:$0xff]   ;;  %v2595_v32 = vld [vmem:[#allocation6 + $0x94] ss:$8 sps:$4 sm:$0xff]   ;;  %v2598_v34 = vld [vmem:[#allocation6 + $0xa4] ss:$8 sps:$4 sm:$0xff]  }
 0x2aa   :  { %v3304_v43 = vpop.permute.xlu1 %342  ;;  %v2596_v35 = vld [vmem:[#allocation6 + $0xa0] ss:$8 sps:$4 sm:$0xff]  }
 0x2ab   :  { %v376_v45 = vadd.f32 %v369_v28, %v360_v39  ;;  %v358_v46 = vmul.f32 %v349_v20, %v3304_v43  ;;  %v359_v47 = vmul.f32 %v353_v21, %v3304_v43  ;;  %v377_v49 = vadd.f32 %v373_v38, %v361_v40  ;;  %872 = vmatpush1.bf16.msra.mxu1 %v2562_v9  ;;  %v2577_v20 = vld [vmem:[#allocation6 + $0x34] ss:$8 sps:$4 sm:$0xff]   ;;  %v2575_v21 = vld [vmem:[#allocation6 + $0x30] ss:$8 sps:$4 sm:$0xff]   ;;  %v418_v36 = vld [vmem:[%s3493_s8] sm:$0x3] }
 0x2ac   :  { %873 = vmatprep.subr.bf16.mxu1 %v2563_v11  ;;  %v423_v37 = vrot.slane %v418_v36, %v3255_v48  ;;  %v2608_v9 = vld [vmem:[#allocation6 + $0xe0] ss:$8 sps:$4 sm:$0xff]   ;;  %v2613_v11 = vld [vmem:[#allocation6 + $0xf4] ss:$8 sps:$4 sm:$0xff]  }
 0x2ad   :  { %v362_v50 = vadd.f32 %v358_v46, %v333_v42  ;;  %v363_v51 = vadd.f32 %v359_v47, %v334_v44  ;;  %2778 = vtanh.f32 %v376_v45 }
 0x2ae   :  { %2780 = vtanh.f32 %v377_v49 }
 0x2af   :  { %v378_v52 = vadd.f32 %v369_v28, %v362_v50  ;;  %v379_v54 = vadd.f32 %v373_v38, %v363_v51  ;;  %874 = vmatpush1.bf16.msra.mxu1 %v2565_v12  ;;  %v2589_v28 = vld [vmem:[#allocation6 + $0x74] ss:$8 sps:$4 sm:$0xff]   ;;  %v427_v38 = vrot.slane %v418_v36, %v3263_v53  ;;  %v2611_v12 = vld [vmem:[#allocation6 + $0xf0] ss:$8 sps:$4 sm:$0xff]  }
 0x2b0   :  { %1369 = vmatprep.subr.bf16.mxu1 %v2616_v15  ;;  %v2656_v15 = vld [vmem:[#allocation7 + $0xe0] ss:$8 sps:$4 sm:$0xff]  }
 0x2b1   :  { %2782 = vtanh.f32 %v378_v52 }
 0x2b2   :  { %2784 = vtanh.f32 %v379_v54 }
 0x2b7   :  { %v3308_v56 = vpop.eup %2778 }
 0x2b8   :  { %v3310_v57 = vpop.eup %2780 }
 0x2bb   :  { %v3312_v58 = vpop.eup %2782 }
 0x2bc   :  { %v3314_v59 = vpop.eup %2784  ;;  %v384_v60 = vpack.c.bf16 %v3312_v58, %v3308_v56 }
 0x2bd   :  { %v385_v62 = vpack.c.bf16 %v3314_v59, %v3310_v57 }
 0x2bf   :  { %622 = vmatprep.mubr.bf16.mxu0 %v385_v62 }
 0x2c0   :  { %623 = vmatmul.mubr.bf16.vlgmr.msra.gmra.mrb[0].mxu0 %v384_v60 }
 0x2c1   :  { %1097 = vmatpush1.bf16.msra.mxu0 %v2566_v13  ;;  %v2614_v13 = vld [vmem:[#allocation7] ss:$8 sps:$4 sm:$0xff]  }
 0x2c2   :  { %1098 = vmatprep.subr.bf16.mxu0 %v2571_v16  ;;  %v2619_v16 = vld [vmem:[#allocation7 + $0x14] ss:$8 sps:$4 sm:$0xff]  }
 0x2c5   :  { %1099 = vmatpush1.bf16.msra.mxu0 %v2569_v17  ;;  %v2617_v17 = vld [vmem:[#allocation7 + $0x10] ss:$8 sps:$4 sm:$0xff]  }
 0x2c6   :  { %1100 = vmatprep.subr.bf16.mxu0 %v2574_v18  ;;  %v2622_v18 = vld [vmem:[#allocation7 + $0x24] ss:$8 sps:$4 sm:$0xff]  }
 0x2c9   :  { %1101 = vmatpush1.bf16.msra.mxu0 %v2572_v19  ;;  %v2620_v19 = vld [vmem:[#allocation7 + $0x20] ss:$8 sps:$4 sm:$0xff]  }
 0x2ca   :  { %1102 = vmatprep.subr.bf16.mxu0 %v2577_v20  ;;  %v2625_v20 = vld [vmem:[#allocation7 + $0x34] ss:$8 sps:$4 sm:$0xff]  }
 0x2cd   :  { %1103 = vmatpush1.bf16.msra.mxu0 %v2575_v21  ;;  %v2623_v21 = vld [vmem:[#allocation7 + $0x30] ss:$8 sps:$4 sm:$0xff]  }
 0x2ce   :  { %1104 = vmatprep.subr.bf16.mxu0 %v2580_v22  ;;  %v2628_v22 = vld [vmem:[#allocation7 + $0x44] ss:$8 sps:$4 sm:$0xff]  }
 0x2d1   :  { %1105 = vmatpush1.bf16.msra.mxu0 %v2578_v1  ;;  %v2626_v1 = vld [vmem:[#allocation7 + $0x40] ss:$8 sps:$4 sm:$0xff]  }
 0x2d2   :  { %1106 = vmatprep.subr.bf16.mxu0 %v2583_v23  ;;  %v2631_v23 = vld [vmem:[#allocation7 + $0x54] ss:$8 sps:$4 sm:$0xff]  }
 0x2d5   :  { %1107 = vmatpush1.bf16.msra.mxu0 %v2581_v24  ;;  %v2629_v24 = vld [vmem:[#allocation7 + $0x50] ss:$8 sps:$4 sm:$0xff]  }
 0x2d6   :  { %1108 = vmatprep.subr.bf16.mxu0 %v2586_v26  ;;  %v2634_v26 = vld [vmem:[#allocation7 + $0x64] ss:$8 sps:$4 sm:$0xff]  }
 0x2d9   :  { %1109 = vmatpush1.bf16.msra.mxu0 %v2584_v27  ;;  %v2632_v27 = vld [vmem:[#allocation7 + $0x60] ss:$8 sps:$4 sm:$0xff]  }
 0x2da   :  { %1110 = vmatprep.subr.bf16.mxu0 %v2589_v28  ;;  %v2637_v28 = vld [vmem:[#allocation7 + $0x74] ss:$8 sps:$4 sm:$0xff]  }
 0x2dd   :  { %1111 = vmatpush1.bf16.msra.mxu0 %v2587_v29  ;;  %v2635_v29 = vld [vmem:[#allocation7 + $0x70] ss:$8 sps:$4 sm:$0xff]  }
 0x2de   :  { %1112 = vmatprep.subr.bf16.mxu0 %v2592_v30  ;;  %v2640_v30 = vld [vmem:[#allocation7 + $0x84] ss:$8 sps:$4 sm:$0xff]  }
 0x2e1   :  { %1113 = vmatpush1.bf16.msra.mxu0 %v2590_v31  ;;  %v2638_v31 = vld [vmem:[#allocation7 + $0x80] ss:$8 sps:$4 sm:$0xff]  }
 0x2e2   :  { %1114 = vmatprep.subr.bf16.mxu0 %v2595_v32  ;;  %v2643_v32 = vld [vmem:[#allocation7 + $0x94] ss:$8 sps:$4 sm:$0xff]  }
 0x2e5   :  { %1115 = vmatpush1.bf16.msra.mxu0 %v2593_v33  ;;  %v2641_v33 = vld [vmem:[#allocation7 + $0x90] ss:$8 sps:$4 sm:$0xff]  }
 0x2e6   :  { %1116 = vmatprep.subr.bf16.mxu0 %v2598_v34  ;;  %v671_v34 = vld [vmem:[%s3495_s10] sm:$0x3] }
 0x2e7   :  { %v680_v36 = vrot.slane %v671_v34, %v3263_v53 }
 0x2e9   :  { %1117 = vmatpush1.bf16.msra.mxu0 %v2596_v35  ;;  %v676_v35 = vrot.slane %v671_v34, %v3255_v48  ;;  %v2688_v34 = vld [vmem:[#allocation9 + $0x84] ss:$8 sps:$4 sm:$0xff]  }
 0x2ea   :  { %1118 = vmatprep.subr.bf16.mxu0 %v2601_v63 }
 0x2ed   :  { %1119 = vmatpush1.bf16.msra.mxu0 %v2599_v2 }
 0x2ee   :  { %1120 = vmatprep.subr.bf16.mxu0 %v2604_v4  ;;  %v2646_v4 = vld [vmem:[#allocation7 + $0xa4] ss:$8 sps:$4 sm:$0xff]  }
 0x2f1   :  { %1121 = vmatpush1.bf16.msra.mxu0 %v2602_v5  ;;  %v2644_v5 = vld [vmem:[#allocation7 + $0xa0] ss:$8 sps:$4 sm:$0xff]  }
 0x2f2   :  { %1122 = vmatprep.subr.bf16.mxu0 %v2607_v7  ;;  %v2647_v7 = vld [vmem:[#allocation7 + $0xb0] ss:$8 sps:$4 sm:$0xff]  }
 0x2f5   :  { %1123 = vmatpush1.bf16.msra.mxu0 %v2605_v6  ;;  %v2649_v6 = vld [vmem:[#allocation7 + $0xb4] ss:$8 sps:$4 sm:$0xff]  }
 0x2f6   :  { %1124 = vmatprep.subr.bf16.mxu0 %v2610_v8  ;;  %v2652_v8 = vld [vmem:[#allocation7 + $0xc4] ss:$8 sps:$4 sm:$0xff]  }
 0x2f9   :  { %1125 = vmatpush1.bf16.msra.mxu0 %v2608_v9  ;;  %v2650_v9 = vld [vmem:[#allocation7 + $0xc0] ss:$8 sps:$4 sm:$0xff]  }
 0x2fa   :  { %1126 = vmatprep.subr.bf16.mxu0 %v2613_v11  ;;  %v2655_v11 = vld [vmem:[#allocation7 + $0xd4] ss:$8 sps:$4 sm:$0xff]  }
 0x2fd   :  { %1127 = vmatpush1.bf16.msra.mxu0 %v2611_v12  ;;  %v2653_v12 = vld [vmem:[#allocation7 + $0xd0] ss:$8 sps:$4 sm:$0xff]  }
 0x393   :  { %v624_v39 = vpop.f32.mrb[0].mxu0 }
 0x394   :  { %v625_v40 = vadd.f32 %v624_v39, %v423_v37  ;;  %v626_v42 = vpop.f32.mrb[1].mxu0 }
 0x395   :  { %v627_v44 = vadd.f32 %v626_v42, %v427_v38  ;;  %v628_v45 = vpop.f32.mrb[2].mxu0 }
 0x396   :  { %2786 = vtanh.f32 %v625_v40  ;;  %v629_v46 = vadd.f32 %v628_v45, %v423_v37  ;;  %v630_v47 = vpop.f32.mrb[3].mxu0 }
 0x397   :  { %2788 = vtanh.f32 %v627_v44  ;;  %v631_v49 = vadd.f32 %v630_v47, %v427_v38 }
 0x398   :  { %2790 = vtanh.f32 %v629_v46 }
 0x399   :  { %2792 = vtanh.f32 %v631_v49 }
 0x3a0   :  { %v3325_v50 = vpop.eup %2786 }
 0x3a1   :  { %v3327_v51 = vpop.eup %2788 }
 0x3a2   :  { %v3329_v52 = vpop.eup %2790 }
 0x3a3   :  { %v3331_v54 = vpop.eup %2792  ;;  %v637_v60 = vpack.c.bf16 %v3329_v52, %v3325_v50 }
 0x3a4   :  { %v638_v62 = vpack.c.bf16 %v3331_v54, %v3327_v51 }
 0x3a6   :  { %875 = vmatprep.mubr.bf16.mxu1 %v638_v62 }
 0x3a7   :  { %876 = vmatmul.mubr.bf16.vlgmr.msra.gmra.mrb[0].mxu1 %v637_v60 }
 0x3a8   :  { %1370 = vmatpush1.bf16.msra.mxu1 %v2614_v13  ;;  %v2658_v13 = vld [vmem:[#allocation7 + $0xe4] ss:$8 sps:$4 sm:$0xff]  }
 0x3a9   :  { %1371 = vmatprep.subr.bf16.mxu1 %v2619_v16  ;;  %v2659_v16 = vld [vmem:[#allocation7 + $0xf0] ss:$8 sps:$4 sm:$0xff]  }
 0x3ac   :  { %1372 = vmatpush1.bf16.msra.mxu1 %v2617_v17  ;;  %v2661_v17 = vld [vmem:[#allocation7 + $0xf4] ss:$8 sps:$4 sm:$0xff]  }
 0x3ad   :  { %1373 = vmatprep.subr.bf16.mxu1 %v2622_v18  ;;  %v2662_v18 = vld [vmem:[#allocation9] ss:$8 sps:$4 sm:$0xff]  }
 0x3b0   :  { %1374 = vmatpush1.bf16.msra.mxu1 %v2620_v19  ;;  %v2664_v19 = vld [vmem:[#allocation9 + $0x4] ss:$8 sps:$4 sm:$0xff]  }
 0x3b1   :  { %1375 = vmatprep.subr.bf16.mxu1 %v2625_v20  ;;  %v2667_v20 = vld [vmem:[#allocation9 + $0x14] ss:$8 sps:$4 sm:$0xff]   ;;  %1618 = vmatprep.subr.bf16.mxu0 %v2664_v19 }
 0x3b4   :  { %1376 = vmatpush1.bf16.msra.mxu1 %v2623_v21  ;;  %v2665_v21 = vld [vmem:[#allocation9 + $0x10] ss:$8 sps:$4 sm:$0xff]  }
 0x3b5   :  { %1377 = vmatprep.subr.bf16.mxu1 %v2628_v22  ;;  %v2670_v22 = vld [vmem:[#allocation9 + $0x24] ss:$8 sps:$4 sm:$0xff]  }
 0x3b8   :  { %1378 = vmatpush1.bf16.msra.mxu1 %v2626_v1  ;;  %v2668_v1 = vld [vmem:[#allocation9 + $0x20] ss:$8 sps:$4 sm:$0xff]  }
 0x3b9   :  { %1379 = vmatprep.subr.bf16.mxu1 %v2631_v23  ;;  %v2673_v23 = vld [vmem:[#allocation9 + $0x34] ss:$8 sps:$4 sm:$0xff]  }
 0x3bc   :  { %1380 = vmatpush1.bf16.msra.mxu1 %v2629_v24  ;;  %v2671_v24 = vld [vmem:[#allocation9 + $0x30] ss:$8 sps:$4 sm:$0xff]  }
 0x3bd   :  { %1381 = vmatprep.subr.bf16.mxu1 %v2634_v26  ;;  %v2676_v26 = vld [vmem:[#allocation9 + $0x44] ss:$8 sps:$4 sm:$0xff]  }
 0x3c0   :  { %1382 = vmatpush1.bf16.msra.mxu1 %v2632_v27  ;;  %v2674_v27 = vld [vmem:[#allocation9 + $0x40] ss:$8 sps:$4 sm:$0xff]  }
 0x3c1   :  { %1383 = vmatprep.subr.bf16.mxu1 %v2637_v28  ;;  %v2679_v28 = vld [vmem:[#allocation9 + $0x54] ss:$8 sps:$4 sm:$0xff]  }
 0x3c4   :  { %1384 = vmatpush1.bf16.msra.mxu1 %v2635_v29  ;;  %v2677_v29 = vld [vmem:[#allocation9 + $0x50] ss:$8 sps:$4 sm:$0xff]  }
 0x3c5   :  { %1385 = vmatprep.subr.bf16.mxu1 %v2640_v30  ;;  %v2682_v30 = vld [vmem:[#allocation9 + $0x64] ss:$8 sps:$4 sm:$0xff]  }
 0x3c8   :  { %1386 = vmatpush1.bf16.msra.mxu1 %v2638_v31  ;;  %v2680_v31 = vld [vmem:[#allocation9 + $0x60] ss:$8 sps:$4 sm:$0xff]  }
 0x3c9   :  { %1387 = vmatprep.subr.bf16.mxu1 %v2643_v32  ;;  %v2685_v32 = vld [vmem:[#allocation9 + $0x74] ss:$8 sps:$4 sm:$0xff]  }
 0x3cc   :  { %1388 = vmatpush1.bf16.msra.mxu1 %v2641_v33  ;;  %v2683_v33 = vld [vmem:[#allocation9 + $0x70] ss:$8 sps:$4 sm:$0xff]  }
 0x3cd   :  { %1389 = vmatprep.subr.bf16.mxu1 %v2646_v4 }
 0x3d0   :  { %1390 = vmatpush1.bf16.msra.mxu1 %v2644_v5 }
 0x3d1   :  { %1391 = vmatprep.subr.bf16.mxu1 %v2649_v6 }
 0x3d4   :  { %1392 = vmatpush1.bf16.msra.mxu1 %v2647_v7 }
 0x3d5   :  { %1393 = vmatprep.subr.bf16.mxu1 %v2652_v8 }
 0x3d8   :  { %1394 = vmatpush1.bf16.msra.mxu1 %v2650_v9 }
 0x3d9   :  { %1395 = vmatprep.subr.bf16.mxu1 %v2655_v11 }
 0x3dc   :  { %1396 = vmatpush1.bf16.msra.mxu1 %v2653_v12 }
 0x3dd   :  { %1397 = vmatprep.subr.bf16.mxu1 %v2658_v13 }
 0x3e0   :  { %1398 = vmatpush1.bf16.msra.mxu1 %v2656_v15 }
 0x3e1   :  { %1399 = vmatprep.subr.bf16.mxu1 %v2661_v17  ;;  %v1151_v17 = vld [vmem:[%s3498_s13] sm:$0x3] }
 0x3e4   :  { %1400 = vmatpush1.bf16.msra.mxu1 %v2659_v16 }
 0x47a   :  { %v877_v37 = vpop.f32.mrb[0].mxu1 }
 0x47b   :  { %v878_v38 = vadd.f32 %v877_v37, %v676_v35  ;;  %v879_v39 = vpop.f32.mrb[1].mxu1  ;;  %v2689_v37 = vld [vmem:[#allocation9 + $0x90] ss:$8 sps:$4 sm:$0xff]  }
 0x47c   :  { %v880_v40 = vadd.f32 %v879_v39, %v680_v36  ;;  %v881_v42 = vpop.f32.mrb[2].mxu1  ;;  %v2692_v39 = vld [vmem:[#allocation9 + $0xa0] ss:$8 sps:$4 sm:$0xff]  }
 0x47d   :  { %2794 = vtanh.f32 %v878_v38  ;;  %v882_v44 = vadd.f32 %v881_v42, %v676_v35  ;;  %v883_v45 = vpop.f32.mrb[3].mxu1  ;;  %v2686_v35 = vld [vmem:[#allocation9 + $0x80] ss:$8 sps:$4 sm:$0xff]   ;;  %v2694_v38 = vld [vmem:[#allocation9 + $0xa4] ss:$8 sps:$4 sm:$0xff]  }
 0x47e   :  { %2796 = vtanh.f32 %v880_v40  ;;  %v884_v46 = vadd.f32 %v883_v45, %v680_v36  ;;  %v2691_v36 = vld [vmem:[#allocation9 + $0x94] ss:$8 sps:$4 sm:$0xff]   ;;  %v2695_v42 = vld [vmem:[#allocation9 + $0xb0] ss:$8 sps:$4 sm:$0xff]   ;;  %v2698_v45 = vld [vmem:[#allocation9 + $0xc0] ss:$8 sps:$4 sm:$0xff]  }
 0x47f   :  { %2798 = vtanh.f32 %v882_v44  ;;  %v2697_v40 = vld [vmem:[#allocation9 + $0xb4] ss:$8 sps:$4 sm:$0xff]   ;;  %v2700_v44 = vld [vmem:[#allocation9 + $0xc4] ss:$8 sps:$4 sm:$0xff]  }
 0x480   :  { %2800 = vtanh.f32 %v884_v46  ;;  %v2703_v46 = vld [vmem:[#allocation9 + $0xd4] ss:$8 sps:$4 sm:$0xff]  }
 0x487   :  { %v3342_v47 = vpop.eup %2794 }
 0x488   :  { %v3344_v49 = vpop.eup %2796 }
 0x489   :  { %v3346_v60 = vpop.eup %2798 }
 0x48a   :  { %v3348_v62 = vpop.eup %2800  ;;  %v890_v63 = vpack.c.bf16 %v3346_v60, %v3342_v47 }
 0x48b   :  { %v891_v2 = vpack.c.bf16 %v3348_v62, %v3344_v49 }
 0x48d   :  { %1128 = vmatprep.mubr.bf16.mxu0 %v891_v2  ;;  %v924_v2 = vld [vmem:[%s3497_s12] sm:$0x3] }
 0x48e   :  { %1129 = vmatmul.mubr.bf16.vlgmr.msra.gmra.mrb[4].mxu0 %v890_v63  ;;  %v2701_v63 = vld [vmem:[#allocation9 + $0xd0] ss:$8 sps:$4 sm:$0xff]   ;;  %v929_v4 = vrot.slane %v924_v2, %v3255_v48  ;;  %v933_v5 = vrot.slane %v924_v2, %v3263_v53 }
 0x48f   :  { %1619 = vmatpush1.bf16.msra.mxu0 %v2662_v18  ;;  %v2719_v2 = vld [vmem:[#allocation10 + $0x30] ss:$8 sps:$4 sm:$0xff]  }
 0x490   :  { %1620 = vmatprep.subr.bf16.mxu0 %v2667_v20 }
 0x493   :  { %1621 = vmatpush1.bf16.msra.mxu0 %v2665_v21 }
 0x494   :  { %1622 = vmatprep.subr.bf16.mxu0 %v2670_v22 }
 0x497   :  { %1623 = vmatpush1.bf16.msra.mxu0 %v2668_v1 }
 0x498   :  { %1624 = vmatprep.subr.bf16.mxu0 %v2673_v23  ;;  %v1156_v23 = vrot.slane %v1151_v17, %v3255_v48  ;;  %v2709_v48 = vld [vmem:[#allocation9 + $0xf4] ss:$8 sps:$4 sm:$0xff]  }
 0x49b   :  { %1625 = vmatpush1.bf16.msra.mxu0 %v2671_v24 }
 0x49c   :  { %1626 = vmatprep.subr.bf16.mxu0 %v2676_v26 }
 0x49f   :  { %1627 = vmatpush1.bf16.msra.mxu0 %v2674_v27 }
 0x4a0   :  { %1628 = vmatprep.subr.bf16.mxu0 %v2679_v28  ;;  %v1160_v28 = vrot.slane %v1151_v17, %v3263_v53  ;;  %v2712_v53 = vld [vmem:[#allocation10 + $0x4] ss:$8 sps:$4 sm:$0xff]   ;;  %v2737_v17 = vld [vmem:[#allocation10 + $0x90] ss:$8 sps:$4 sm:$0xff]  }
 0x4a1   :  { %1867 = vmatprep.subr.bf16.mxu1 %v2712_v53  ;;  %v2752_v53 = vld [vmem:[#allocation10 + $0xe0] ss:$8 sps:$4 sm:$0xff]  }
 0x4a3   :  { %1629 = vmatpush1.bf16.msra.mxu0 %v2677_v29 }
 0x4a4   :  { %1630 = vmatprep.subr.bf16.mxu0 %v2682_v30 }
 0x4a7   :  { %1631 = vmatpush1.bf16.msra.mxu0 %v2680_v31 }
 0x4a8   :  { %1632 = vmatprep.subr.bf16.mxu0 %v2685_v32 }
 0x4ab   :  { %1633 = vmatpush1.bf16.msra.mxu0 %v2683_v33 }
 0x4ac   :  { %1634 = vmatprep.subr.bf16.mxu0 %v2688_v34 }
 0x4af   :  { %1635 = vmatpush1.bf16.msra.mxu0 %v2686_v35 }
 0x4b0   :  { %1636 = vmatprep.subr.bf16.mxu0 %v2691_v36 }
 0x4b3   :  { %1637 = vmatpush1.bf16.msra.mxu0 %v2689_v37  ;;  %v2706_v37 = vld [vmem:[#allocation9 + $0xe4] ss:$8 sps:$4 sm:$0xff]  }
 0x4b4   :  { %1638 = vmatprep.subr.bf16.mxu0 %v2694_v38  ;;  %v2704_v38 = vld [vmem:[#allocation9 + $0xe0] ss:$8 sps:$4 sm:$0xff]  }
 0x4b7   :  { %1639 = vmatpush1.bf16.msra.mxu0 %v2692_v39  ;;  %v2707_v39 = vld [vmem:[#allocation9 + $0xf0] ss:$8 sps:$4 sm:$0xff]  }
 0x4b8   :  { %1640 = vmatprep.subr.bf16.mxu0 %v2697_v40  ;;  %v2710_v40 = vld [vmem:[#allocation10] ss:$8 sps:$4 sm:$0xff]  }
 0x4bb   :  { %1641 = vmatpush1.bf16.msra.mxu0 %v2695_v42  ;;  %v2715_v42 = vld [vmem:[#allocation10 + $0x14] ss:$8 sps:$4 sm:$0xff]  }
 0x4bc   :  { %1642 = vmatprep.subr.bf16.mxu0 %v2700_v44  ;;  %v2713_v44 = vld [vmem:[#allocation10 + $0x10] ss:$8 sps:$4 sm:$0xff]  }
 0x4bf   :  { %1643 = vmatpush1.bf16.msra.mxu0 %v2698_v45  ;;  %v2718_v45 = vld [vmem:[#allocation10 + $0x24] ss:$8 sps:$4 sm:$0xff]  }
 0x4c0   :  { %1644 = vmatprep.subr.bf16.mxu0 %v2703_v46  ;;  %v2716_v46 = vld [vmem:[#allocation10 + $0x20] ss:$8 sps:$4 sm:$0xff]  }
 0x4c3   :  { %1645 = vmatpush1.bf16.msra.mxu0 %v2701_v63  ;;  %v2721_v63 = vld [vmem:[#allocation10 + $0x34] ss:$8 sps:$4 sm:$0xff]  }
 0x4c4   :  { %1646 = vmatprep.subr.bf16.mxu0 %v2706_v37 }
 0x4c7   :  { %1647 = vmatpush1.bf16.msra.mxu0 %v2704_v38 }
 0x4c8   :  { %1648 = vmatprep.subr.bf16.mxu0 %v2709_v48 }
 0x4cb   :  { %1649 = vmatpush1.bf16.msra.mxu0 %v2707_v39 }
 0x561   :  { %v1130_v6 = vpop.f32.mrb[4].mxu0 }
 0x562   :  { %v1131_v7 = vadd.f32 %v1130_v6, %v929_v4  ;;  %v1132_v8 = vpop.f32.mrb[5].mxu0  ;;  %v2727_v6 = vld [vmem:[#allocation10 + $0x54] ss:$8 sps:$4 sm:$0xff]  }
 0x563   :  { %v1133_v9 = vadd.f32 %v1132_v8, %v933_v5  ;;  %v1134_v11 = vpop.f32.mrb[6].mxu0  ;;  %v2730_v8 = vld [vmem:[#allocation10 + $0x64] ss:$8 sps:$4 sm:$0xff]  }
 0x564   :  { %2802 = vtanh.f32 %v1131_v7  ;;  %v1135_v12 = vadd.f32 %v1134_v11, %v929_v4  ;;  %v1136_v13 = vpop.f32.mrb[7].mxu0  ;;  %v2724_v4 = vld [vmem:[#allocation10 + $0x44] ss:$8 sps:$4 sm:$0xff]   ;;  %v2725_v7 = vld [vmem:[#allocation10 + $0x50] ss:$8 sps:$4 sm:$0xff]  }
 0x565   :  { %2804 = vtanh.f32 %v1133_v9  ;;  %v1137_v15 = vadd.f32 %v1136_v13, %v933_v5  ;;  %v2722_v5 = vld [vmem:[#allocation10 + $0x40] ss:$8 sps:$4 sm:$0xff]   ;;  %v2733_v11 = vld [vmem:[#allocation10 + $0x74] ss:$8 sps:$4 sm:$0xff]   ;;  %v2736_v13 = vld [vmem:[#allocation10 + $0x84] ss:$8 sps:$4 sm:$0xff]  }
 0x566   :  { %2806 = vtanh.f32 %v1135_v12  ;;  %v2728_v9 = vld [vmem:[#allocation10 + $0x60] ss:$8 sps:$4 sm:$0xff]   ;;  %v2731_v12 = vld [vmem:[#allocation10 + $0x70] ss:$8 sps:$4 sm:$0xff]  }
 0x567   :  { %2808 = vtanh.f32 %v1137_v15  ;;  %v2734_v15 = vld [vmem:[#allocation10 + $0x80] ss:$8 sps:$4 sm:$0xff]  }
 0x56e   :  { %v2803_v16 = vpop.eup %2802 }
 0x56f   :  { %v2805_v18 = vpop.eup %2804  ;;  %v1143_v19 = vmul.f32 %v2803_v16, %v2803_v16  ;;  %v2739_v16 = vld [vmem:[#allocation10 + $0x94] ss:$8 sps:$4 sm:$0xff]  }
 0x570   :  { %v2807_v20 = vpop.eup %2806  ;;  %v1144_v21 = vmul.f32 %v2805_v18, %v2805_v18  ;;  %v2742_v18 = vld [vmem:[#allocation10 + $0xa4] ss:$8 sps:$4 sm:$0xff]  }
 0x571   :  { %v2809_v22 = vpop.eup %2808  ;;  %v1147_v1 = vsub.f32 1.0, %v1143_v19  ;;  %v1145_v24 = vmul.f32 %v2807_v20, %v2807_v20  ;;  %v2740_v19 = vld [vmem:[#allocation10 + $0xa0] ss:$8 sps:$4 sm:$0xff]   ;;  %v2745_v20 = vld [vmem:[#allocation10 + $0xb4] ss:$8 sps:$4 sm:$0xff]  }
 0x572   :  { %v1148_v26 = vsub.f32 1.0, %v1144_v21  ;;  %v1146_v27 = vmul.f32 %v2809_v22, %v2809_v22  ;;  %v2743_v21 = vld [vmem:[#allocation10 + $0xb0] ss:$8 sps:$4 sm:$0xff]   ;;  %v2748_v22 = vld [vmem:[#allocation10 + $0xc4] ss:$8 sps:$4 sm:$0xff]  }
 0x573   :  { %v1149_v29 = vsub.f32 1.0, %v1145_v24  ;;  %v1163_v31 = vmul.f32 %v1156_v23, %v1147_v1  ;;  %v2746_v1 = vld [vmem:[#allocation10 + $0xc0] ss:$8 sps:$4 sm:$0xff]   ;;  %v2749_v24 = vld [vmem:[#allocation10 + $0xd0] ss:$8 sps:$4 sm:$0xff]  }
 0x574   :  { %v1150_v30 = vsub.f32 1.0, %v1146_v27  ;;  %v1164_v33 = vmul.f32 %v1160_v28, %v1148_v26  ;;  %v1167_v26 = vmul.f32 %v3342_v47, %v3342_v47  ;;  %v1168_v27 = vmul.f32 %v3344_v49, %v3344_v49 }
 0x575   :  { %v1165_v32 = vmul.f32 %v1156_v23, %v1149_v29  ;;  %v2751_v23 = vld [vmem:[#allocation10 + $0xd4] ss:$8 sps:$4 sm:$0xff]   ;;  %v1170_v29 = vmul.f32 %v3348_v62, %v3348_v62 }
 0x576   :  { %v1166_v34 = vmul.f32 %v1160_v28, %v1150_v30  ;;  %v1169_v28 = vmul.f32 %v3346_v60, %v3346_v60  ;;  %v1171_v30 = vsub.f32 1.0, %v1167_v26  ;;  %v2754_v60 = vld [vmem:[#allocation10 + $0xe4] ss:$8 sps:$4 sm:$0xff]   ;;  %v2757_v62 = vld [vmem:[#allocation10 + $0xf4] ss:$8 sps:$4 sm:$0xff]  }
 0x577   :  { %v1175_v35 = vpack.c.bf16 %v1165_v32, %v1163_v31  ;;  %v1172_v32 = vsub.f32 1.0, %v1168_v27  ;;  %v1174_v38 = vsub.f32 1.0, %v1170_v29  ;;  %v2772_v29 = vld [vmem:[%s3502_s17 + $0x78] sm:$0xff]  }
 0x578   :  { %v1176_v36 = vpack.c.bf16 %v1166_v34, %v1164_v33 }
 0x57a   :  { %1401 = vmatprep.mubr.bf16.mxu1 %v1176_v36 }
 0x57b   :  { %1402 = vmatmul.mubr.bf16.vlgmr.msra.gmra.mrb[4].mxu1 %v1175_v35  ;;  %v1173_v35 = vsub.f32 1.0, %v1169_v28 }
 0x57c   :  { %1868 = vmatpush1.bf16.msra.mxu1 %v2710_v40 }
 0x57d   :  { %1869 = vmatprep.subr.bf16.mxu1 %v2715_v42  ;;  %v2755_v42 = vld [vmem:[#allocation10 + $0xf0] ss:$8 sps:$4 sm:$0xff]  }
 0x580   :  { %1870 = vmatpush1.bf16.msra.mxu1 %v2713_v44  ;;  %v2758_v44 = vld [vmem:[%s3502_s17 + $0x40] sm:$0xff]  }
 0x581   :  { %1871 = vmatprep.subr.bf16.mxu1 %v2718_v45  ;;  %v2759_v45 = vld [vmem:[%s3502_s17] sm:$0xff]   ;;  %2423 = vmatprep.subr.bf16.mxu0 %v2758_v44  ;;  %v2116_v44 = vmul.f32 %v3295_v25, %v3304_v43 }
 0x582   :  { %v2815_v25 = vld [vmem:[%s3514_s2 + $0x1] ss:$0 sm:$0xff] }
 0x584   :  { %1872 = vmatpush1.bf16.msra.mxu1 %v2716_v46  ;;  %v2760_v46 = vld [vmem:[%s3502_s17 + $0x48] sm:$0xff]  }
 0x585   :  { %1873 = vmatprep.subr.bf16.mxu1 %v2721_v63  ;;  %v2761_v63 = vld [vmem:[%s3502_s17 + $0x8] sm:$0xff]  }
 0x588   :  { %1874 = vmatpush1.bf16.msra.mxu1 %v2719_v2  ;;  %v2762_v2 = vld [vmem:[%s3502_s17 + $0x50] sm:$0xff]  }
 0x589   :  { %1875 = vmatprep.subr.bf16.mxu1 %v2724_v4  ;;  %v2763_v4 = vld [vmem:[%s3502_s17 + $0x10] sm:$0xff]  }
 0x58c   :  { %1876 = vmatpush1.bf16.msra.mxu1 %v2722_v5  ;;  %v2764_v5 = vld [vmem:[%s3502_s17 + $0x58] sm:$0xff]  }
 0x58d   :  { %1877 = vmatprep.subr.bf16.mxu1 %v2727_v6  ;;  %v2765_v6 = vld [vmem:[%s3502_s17 + $0x18] sm:$0xff]  }
 0x590   :  { %1878 = vmatpush1.bf16.msra.mxu1 %v2725_v7  ;;  %v2766_v7 = vld [vmem:[%s3502_s17 + $0x60] sm:$0xff]  }
 0x591   :  { %1879 = vmatprep.subr.bf16.mxu1 %v2730_v8  ;;  %v2767_v8 = vld [vmem:[%s3502_s17 + $0x20] sm:$0xff]  }
 0x594   :  { %1880 = vmatpush1.bf16.msra.mxu1 %v2728_v9  ;;  %v2768_v9 = vld [vmem:[%s3502_s17 + $0x68] sm:$0xff]  }
 0x595   :  { %1881 = vmatprep.subr.bf16.mxu1 %v2733_v11  ;;  %v2769_v11 = vld [vmem:[%s3502_s17 + $0x28] sm:$0xff]  }
 0x598   :  { %1882 = vmatpush1.bf16.msra.mxu1 %v2731_v12  ;;  %v1416_v12 = vmul.f32 %v3325_v50, %v3325_v50 }
 0x599   :  { %1883 = vmatprep.subr.bf16.mxu1 %v2736_v13  ;;  %v1417_v13 = vmul.f32 %v3327_v51, %v3327_v51 }
 0x59c   :  { %1884 = vmatpush1.bf16.msra.mxu1 %v2734_v15  ;;  %v1418_v15 = vmul.f32 %v3329_v52, %v3329_v52  ;;  %v2770_v52 = vld [vmem:[%s3502_s17 + $0x70] sm:$0xff]  }
 0x59d   :  { %1885 = vmatprep.subr.bf16.mxu1 %v2739_v16  ;;  %v1419_v16 = vmul.f32 %v3331_v54, %v3331_v54  ;;  %v2771_v54 = vld [vmem:[%s3502_s17 + $0x30] sm:$0xff]  }
 0x5a0   :  { %1886 = vmatpush1.bf16.msra.mxu1 %v2737_v17  ;;  %v1420_v17 = vsub.f32 1.0, %v1416_v12 }
 0x5a1   :  { %1887 = vmatprep.subr.bf16.mxu1 %v2742_v18 }
 0x5a4   :  { %1888 = vmatpush1.bf16.msra.mxu1 %v2740_v19  ;;  %v1421_v19 = vsub.f32 1.0, %v1417_v13 }
 0x5a5   :  { %1889 = vmatprep.subr.bf16.mxu1 %v2745_v20 }
 0x5a8   :  { %1890 = vmatpush1.bf16.msra.mxu1 %v2743_v21 }
 0x5a9   :  { %1891 = vmatprep.subr.bf16.mxu1 %v2748_v22  ;;  %v1422_v22 = vsub.f32 1.0, %v1418_v15 }
 0x5ac   :  { %1892 = vmatpush1.bf16.msra.mxu1 %v2746_v1 }
 0x5ad   :  { %1893 = vmatprep.subr.bf16.mxu1 %v2751_v23 }
 0x5b0   :  { %1894 = vmatpush1.bf16.msra.mxu1 %v2749_v24  ;;  %v1423_v24 = vsub.f32 1.0, %v1419_v16 }
 0x5b1   :  { %1895 = vmatprep.subr.bf16.mxu1 %v2754_v60 }
 0x5b4   :  { %1896 = vmatpush1.bf16.msra.mxu1 %v2752_v53 }
 0x5b5   :  { %1897 = vmatprep.subr.bf16.mxu1 %v2757_v62 }
 0x5b8   :  { %1898 = vmatpush1.bf16.msra.mxu1 %v2755_v42 }
 0x64e   :  { %v1403_v31 = vpop.f32.mrb[4].mxu1 }
 0x64f   :  { %v1412_v33 = vmul.f32 %v1403_v31, %v1171_v30  ;;  %v1405_v34 = vpop.f32.mrb[5].mxu1  ;;  %v2773_v30 = vld [vmem:[%s3502_s17 + $0x38] sm:$0xff]   ;;  %v1665_v31 = vmul.f32 %v3308_v56, %v3308_v56 }
 0x650   :  { %v1413_v36 = vmul.f32 %v1405_v34, %v1172_v32  ;;  %v1407_v37 = vpop.f32.mrb[6].mxu1  ;;  %v1666_v32 = vmul.f32 %v3310_v57, %v3310_v57  ;;  %v1668_v34 = vmul.f32 %v3314_v59, %v3314_v59 }
 0x651   :  { %v1414_v48 = vmul.f32 %v1407_v37, %v1173_v35  ;;  %v1409_v47 = vpop.f32.mrb[7].mxu1  ;;  %v1669_v35 = vsub.f32 1.0, %v1665_v31 }
 0x652   :  { %v1415_v39 = vmul.f32 %v1409_v47, %v1174_v38  ;;  %v1670_v37 = vsub.f32 1.0, %v1666_v32 }
 0x653   :  { %v1424_v40 = vpack.c.bf16 %v1414_v48, %v1412_v33  ;;  %v1667_v33 = vmul.f32 %v3312_v58, %v3312_v58  ;;  %v2107_v58 = vmul.f32 %v3282_v10, %v3284_v14  ;;  %v2814_v14 = vld [vmem:[%s3514_s2] ss:$0 sm:$0xff] }
 0x654   :  { %v1425_v49 = vpack.c.bf16 %v1415_v39, %v1413_v36 }
 0x655   :  { %v1671_v47 = vsub.f32 1.0, %v1667_v33 }
 0x656   :  { %1650 = vmatprep.mubr.bf16.mxu0 %v1425_v49  ;;  %v1672_v49 = vsub.f32 1.0, %v1668_v34 }
 0x657   :  { %1651 = vmatmul.mubr.bf16.vlgmr.msra.gmra.mrb[8].mxu0 %v1424_v40 }
 0x658   :  { %2424 = vmatpush3.bf16.msra.mxu0 %v2759_v45 }
 0x659   :  { %2425 = vmatprep.subr.bf16.mxu0 %v2760_v46 }
 0x65c   :  { %2426 = vmatpush3.bf16.msra.mxu0 %v2761_v63 }
 0x65d   :  { %2427 = vmatprep.subr.bf16.mxu0 %v2762_v2  ;;  %v2109_v2 = vadd.f32 %v2107_v58, %v3272_v3 }
 0x660   :  { %2428 = vmatpush3.bf16.msra.mxu0 %v2763_v4 }
 0x661   :  { %2429 = vmatprep.subr.bf16.mxu0 %v2764_v5 }
 0x664   :  { %2430 = vmatpush3.bf16.msra.mxu0 %v2765_v6  ;;  %v2118_v6 = vadd.f32 %v2116_v44, %v2109_v2 }
 0x665   :  { %2431 = vmatprep.subr.bf16.mxu0 %v2766_v7 }
 0x668   :  { %2432 = vmatpush3.bf16.msra.mxu0 %v2767_v8 }
 0x669   :  { %2433 = vmatprep.subr.bf16.mxu0 %v2768_v9 }
 0x66c   :  { %2434 = vmatpush3.bf16.msra.mxu0 %v2769_v11 }
 0x66d   :  { %2435 = vmatprep.subr.bf16.mxu0 %v2770_v52 }
 0x670   :  { %2436 = vmatpush3.bf16.msra.mxu0 %v2771_v54 }
 0x671   :  { %2437 = vmatprep.subr.bf16.mxu0 %v2772_v29 }
 0x674   :  { %2438 = vmatpush3.bf16.msra.mxu0 %v2773_v30 }
 0x72a   :  { %v1652_v18 = vpop.f32.mrb[8].mxu0 }
 0x72b   :  { %v1661_v20 = vmul.f32 %v1652_v18, %v1420_v17  ;;  %v1654_v21 = vpop.f32.mrb[9].mxu0 }
 0x72c   :  { %v1662_v1 = vmul.f32 %v1654_v21, %v1421_v19  ;;  %v1656_v23 = vpop.f32.mrb[10].mxu0  ;;  %v2817_v19 = vld [vmem:[%s3516_s14] ss:$0 sm:$0xff] }
 0x72d   :  { %v1663_v26 = vmul.f32 %v1656_v23, %v1422_v22  ;;  %v1658_v50 = vpop.f32.mrb[11].mxu0 }
 0x72e   :  { %v1664_v27 = vmul.f32 %v1658_v50, %v1423_v24  ;;  %v2819_v50 = vld [vmem:[%s3489_s4] ss:$0 sm:$0xff] }
 0x72f   :  { %v1673_v28 = vpack.c.bf16 %v1663_v26, %v1661_v20 }
 0x730   :  { %v1674_v51 = vpack.c.bf16 %v1664_v27, %v1662_v1  ;;  %v2818_v1 = vld [vmem:[%s3516_s14 + $0x1] ss:$0 sm:$0xff] }
 0x732   :  { %1899 = vmatprep.mubr.bf16.mxu1 %v1674_v51 }
 0x733   :  { %1900 = vmatmul.mubr.bf16.vlgmr.msra.gmra.mrb[8].mxu1 %v1673_v28 }
 0x806   :  { %v1901_v36 = vpop.f32.mrb[8].mxu1 }
 0x807   :  { %v1910_v38 = vmul.f32 %v1901_v36, %v1669_v35  ;;  %v1903_v48 = vpop.f32.mrb[9].mxu1 }
 0x808   :  { %v1911_v39 = vmul.f32 %v1903_v48, %v1670_v37  ;;  %v1905_v40 = vpop.f32.mrb[10].mxu1 }
 0x809   :  { %v1912_v60 = vmul.f32 %v1905_v40, %v1671_v47  ;;  %v1907_v56 = vpop.f32.mrb[11].mxu1 }
 0x80a   :  { %v1913_v53 = vmul.f32 %v1907_v56, %v1672_v49 }
 0x80b   :  { %v1914_v62 = vpack.c.bf16 %v1912_v60, %v1910_v38 }
 0x80c   :  { %v1915_v57 = vpack.c.bf16 %v1913_v53, %v1911_v39 }
 0x80e   :  { %2076 = vmatprep.mubr.bf16.mxu0 %v1915_v57 }
 0x80f   :  { %2077 = vmatmul.mubr.bf16.vlgmr.msra.gmra.mrb[12].mxu0 %v1914_v62 }
 0x8e2   :  { %v2439_v59 = vpop.f32.mrb[12].mxu0 }
 0x8e3   :  { %v2440_v42 = vpop.f32.mrb[13].mxu0 }
 0x8e4   :  { %v2441_v45 = vadd.f32 %v2440_v42, %v2439_v59  ;;  %v2442_v46 = vpop.f32.mrb[14].mxu0 }
 0x8e5   :  { %v2443_v63 = vpop.f32.mrb[15].mxu0 }
 0x8e6   :  { %v2119_v4 = vadd.f32 %v2441_v45, %v3229_v55  ;;  %v2444_v5 = vadd.f32 %v2443_v63, %v2442_v46 }
 0x8e8   :  { %v2121_v7 = vadd.f32 %v2119_v4, %v3302_v41  ;;  %v2120_v8 = vadd.f32 %v2444_v5, %v3236_v61 }
 0x8ea   :  { %v3444_v9 = vadd.f32 %v2120_v8, %v2118_v6  ;;  %2125 = vperm.xlu0 %2466, %v2121_v7  }
 0x8ec   :  { %2130 = vperm.xlu1 %2467, %v3444_v9  }
 0x8ee   :  { %2469 = vset.pattern.permute.xlu0 %v2968_v0 }
 0x8ef   :  { %2140 = vperm.xlu0 %2469, %v3444_v9  }
 0x8f0   :  { %2468 = vset.pattern.permute.xlu1 %v2968_v0  ;;  %v2816_v0 = vld [vmem:[%s3515_s7] ss:$0 sm:$0xff] }
 0x8f1   :  { %2136 = vperm.xlu1 %2468, %v2121_v7  }
 0x969   :  { %v2126_v3 = vpop.permute.xlu0 %2125 }
 0x96a   :  { %v2133_v11 = vmul.f32 %v2814_v14, %v2126_v3 }
 0x96b   :  { %v2131_v55 = vpop.permute.xlu1 %2130 }
 0x96c   :  { %v2134_v61 = vmul.f32 %v2814_v14, %v2131_v55 }
 0x96e   :  { %v2141_v10 = vpop.permute.xlu0 %2140 }
 0x96f   :  { %v2144_v41 = vmul.f32 %v2815_v25, %v2141_v10 }
 0x970   :  { %v2137_v43 = vpop.permute.xlu1 %2136 }
 0x971   :  { %v2146_v12 = vadd.f32 %v2144_v41, %v2134_v61  ;;  %v2143_v13 = vmul.f32 %v2815_v25, %v2137_v43 }
 0x973   :  { %v2148_v15 = vadd.f32 %v2816_v0, %v2146_v12  ;;  %v2145_v16 = vadd.f32 %v2143_v13, %v2133_v11 }
 0x975   :  { %2810 = vtanh.f32 %v2148_v15  ;;  %v2147_v17 = vadd.f32 %v2816_v0, %v2145_v16 }
 0x977   :  { %2812 = vtanh.f32 %v2147_v17 }
 0x97f   :  { %v2811_v18 = vpop.eup %2810 }
 0x980   :  { %v2152_v20 = vmul.f32 %v2817_v19, %v2811_v18  ;;  %v2160_v23 = vmul.f32 %v2818_v1, %v2811_v18 }
 0x981   :  { %v2813_v21 = vpop.eup %2812 }
 0x982   :  { %2155 = vadd.xlane.f32.xlu0 %v2152_v20  ;;  %v2151_v22 = vmul.f32 %v2817_v19, %v2813_v21  ;;  %v2159_v24 = vmul.f32 %v2818_v1, %v2813_v21 }
 0x984   :  { %2153 = vadd.xlane.f32.xlu1 %v2151_v22 }
 0x986   :  { %2163 = vadd.xlane.f32.xlu0 %v2160_v23 }
 0x988   :  { %2161 = vadd.xlane.f32.xlu1 %v2159_v24 }
 0xa0f   :  { %v2156_v26 = vpop.xlane.xlu0 %2155 }
 0xa10   :  { %v2158_v27 = vadd.f32 %v2819_v50, %v2156_v26 }
 0xa11   :  { %v2154_v28 = vpop.xlane.xlu1 %2153 }
 0xa12   :  { %v2157_v51 = vadd.f32 %v2819_v50, %v2154_v28  ;;  %2171 = vrot.lane.b32.xlu0 %v2158_v27, %s2970_s3 }
 0xa13   :  { %v2164_v29 = vpop.xlane.xlu0 %2163 }
 0xa14   :  { %2169 = vrot.lane.b32.xlu1 %v2157_v51, %s2970_s3  ;;  %v2166_v30 = vadd.f32 %v2819_v50, %v2164_v29 }
 0xa15   :  { %v2162_v52 = vpop.xlane.xlu1 %2161 }
 0xa16   :  { %v2165_v54 = vadd.f32 %v2819_v50, %v2162_v52 }
 0xa18   :  { %2179 = vrot.lane.b32.xlu1 %v2165_v54, %s2970_s3 }
 0xa1c   :  { %2181 = vrot.lane.b32.xlu1 %v2166_v30, %s2970_s3 }
 0xa84   :  { %v2172_v33 = vpop.permute.xlu0 %2171 }
 0xa85   :  { %v2176_v36 = vsub.f32 %v3444_v9, %v2172_v33 }
 0xa86   :  { %v2170_v31 = vpop.permute.xlu1 %2169 }
 0xa87   :  { %v2175_v32 = vsub.f32 %v2121_v7, %v2170_v31  ;;  %v2188_v39 = vsel %vm245_vm0, %v3444_v9, %v2176_v36 }
 0xa89   :  { %v2187_v37 = vsel %vm245_vm0, %v2121_v7, %v2175_v32 }
 0xa8a   :  { %v2180_v34 = vpop.permute.xlu1 %2179 }
 0xa8b   :  { %v2185_v35 = vsub.f32 %v2121_v7, %v2180_v34 }
 0xa8d   :  { %v2189_v38 = vsel %vm248_vm1, %v2187_v37, %v2185_v35 }
 0xa8e   :  { %2192 = vst.msk [vmem:[%s3504_s19] sm:$0xff] %vm2191_vm2, %v2189_v38  ;;  %v2182_v48 = vpop.permute.xlu1 %2181 }
 0xa8f   :  { %v2186_v47 = vsub.f32 %v3444_v9, %v2182_v48 }
 0xa91   :  { %v2190_v40 = vsel %vm248_vm1, %v2188_v39, %v2186_v47 }
 0xa92   :  { %2193 = vst.msk [vmem:[%s3504_s19 + $0x8] sm:$0xff] %vm2191_vm2, %v2190_v40 }
 0xa93   :  { %2198 = vsyncpa [#allocation3], 1 }
 0xa94   :  { %2199 = vsyncpa [#allocation5], 1 }
 0xa95   :  { %2200 = vsyncpa [#allocation8], 1 }
 0xa96   :  { %2201 = vsyncpa [#allocation11], 1 }

</bundles_post_ra>
